<compile_context>
chip_gen: v6e
topology: v6e:2x2x1
jax: 0.10.0
libtpu: 0.0.40
codegen_flags: <defaults>
</compile_context>

<pallas_src>
import functools

import jax
import jax.numpy as jnp
from jax.experimental import pallas as pl
from jax.experimental.pallas import tpu as pltpu

# (Cin, Cout, relu_after) for every conv, "M" for 2x2/stride-2 max-pool == vgg19.features[:35]
VGG19_54_CFG = [
    (3, 64, True), (64, 64, True), "M",
    (64, 128, True), (128, 128, True), "M",
    (128, 256, True), (256, 256, True), (256, 256, True), (256, 256, True), "M",
    (256, 512, True), (512, 512, True), (512, 512, True), (512, 512, True), "M",
    (512, 512, True), (512, 512, True), (512, 512, True), (512, 512, False),
]


def _round_up(x, m):
    return (x + m - 1) // m * m


# --------------------------------------------------------------- wide-flat layout helpers
def to_wide(x_nhwc):
    """(N,H,W,C) -> (N, H*(W+2), C): 2 extra zero columns per image row (lane-dense rows)."""
    n, h, w, c = x_nhwc.shape
    return jnp.pad(x_nhwc, ((0, 0), (0, 0), (0, 2), (0, 0))).reshape(n, h * (w + 2), c)


def from_wide(x_wide, h, w):
    n, _, c = x_wide.shape
    return x_wide.reshape(n, h, w + 2, c)[:, :, :w, :]


# --------------------------------------------------------------------- conv 3x3, padding 1
def _conv3x3_kernel(xa_ref, xb_ref, w_ref, b_ref, o_ref, xs_ref, acc_ref,
                    *, wp, tm, halo_p, w_img, relu):
    """xa: (TM, Cin) bf16 row block of the zero-padded row-flattened image.
       xb: (HB, Cin) bf16 head of the *next* row block (halo rows only).
       w: (9, Cin, TN) bf16; b: (1, TN) f32; o: (TM, TN) bf16.
       xs: VMEM (TM + HALO_P, Cin) bf16 scratch; acc: VMEM (TM, TN) f32 accumulator."""
    cin = xa_ref.shape[-1]
    hb = xb_ref.shape[0]
    # assemble the rows this tile needs: own block + small halo block from the next tile
    xs_ref[0:tm, :] = xa_ref[...]
    xs_ref[tm:tm + hb, :] = xb_ref[...]
    if hb < halo_p:                               # tiny deep layers: pad tail with zeros
        xs_ref[tm + hb:, :] = jnp.zeros((halo_p - hb, cin), xa_ref.dtype)

    # 9 shifted taps -> 9 MXU matmuls accumulated in f32 (first tap writes, rest add).
    first = True
    for dy in range(3):
        for dx in range(3):
            off = dy * wp + dx                    # static tap offset into flattened rows
            contrib = jnp.dot(xs_ref[off:off + tm, :], w_ref[dy * 3 + dx],
                              preferred_element_type=jnp.float32)
            if first:
                acc_ref[...] = contrib
                first = False
            else:
                acc_ref[...] += contrib

    out = acc_ref[...] + b_ref[...]
    if relu:
        out = jnp.maximum(out, 0.0)
    # zero the 2 pad columns so the output is directly consumable (after a single offset
    # jnp.pad) as the next conv's zero-padded input, or directly by the pool kernel.
    row = jax.lax.broadcasted_iota(jnp.int32, (tm, 1), 0) + pl.program_id(1) * tm
    out = jnp.where((row % wp) < w_img, out, 0.0)
    o_ref[...] = out.astype(o_ref.dtype)


def _row_tiling(h, wp, target_rows=1024):
    """Pick a row tile TM = TH*(W+2): multiple of 8, <= ~1024 rows, safe halo coverage."""
    halo = _round_up(2 * wp + 2, 8)
    cand = [d for d in range(1, h + 1)
            if h % d == 0 and (d * wp) % 8 == 0 and (d == h or d * wp >= halo)]
    if cand:
        small = [d for d in cand if d * wp <= target_rows]
        th = max(small) if small else min(cand)
        return th * wp, h // th
    # fallback: single tile, rounded up to a sublane multiple (output sliced afterwards)
    return _round_up(h * wp, 8), 1


def conv3x3_wide(x_wide, h, w, weight, bias, relu):
    """x_wide: (N, h*(w+2), Cin) wide-flat (pad cols zeroed); weight: (Cout,Cin,3,3) OIHW.
       Returns (N, h*(w+2), Cout) bf16 wide-flat with pad columns zeroed."""
    x_wide = x_wide.astype(jnp.bfloat16)
    n, l_rows, cin_x = x_wide.shape
    wp = w + 2
    assert l_rows == h * wp
    cout, cin_w = weight.shape[0], weight.shape[1]

    tm, n_row_tiles = _row_tiling(h, wp)
    halo_p = _round_up(2 * wp + 2, 8)
    hb = min(halo_p, tm)                          # halo block rows actually fetched
    tn = min(cout, 256)                           # Cout tile matched to 256-wide MXU
    assert cout % tn == 0
    n_cout_tiles = cout // tn

    # single glue op per layer: shift by one padded row+col and zero-extend the bottom
    rows_padded = (n_row_tiles + 1) * tm
    flat = jnp.pad(x_wide, ((0, 0), (wp + 1, rows_padded - (wp + 1) - l_rows), (0, 0)))
    flat4 = flat.reshape(n, n_row_tiles + 1, tm, cin_x)   # free row-major reshape

    wt = jnp.transpose(weight, (2, 3, 1, 0)).reshape(9, cin_w, cout)
    if cin_x != cin_w:                            # first layer: image channels lane-padded
        wt = jnp.pad(wt, ((0, 0), (0, cin_x - cin_w), (0, 0)))
    wt = wt.astype(jnp.bfloat16)
    bt = bias.reshape(1, cout).astype(jnp.float32)

    kern = functools.partial(_conv3x3_kernel, wp=wp, tm=tm, halo_p=halo_p,
                             w_img=w, relu=relu)
    out = pl.pallas_call(
        kern,
        out_shape=jax.ShapeDtypeStruct((n, n_row_tiles * tm, cout), jnp.bfloat16),
        grid=(n, n_row_tiles, n_cout_tiles),
        in_specs=[
            pl.BlockSpec((None, None, tm, cin_x), lambda b, i, j: (b, i, 0, 0)),
            pl.BlockSpec((None, None, hb, cin_x), lambda b, i, j: (b, i + 1, 0, 0)),
            pl.BlockSpec((9, cin_x, tn), lambda b, i, j: (0, 0, j)),
            pl.BlockSpec((1, tn), lambda b, i, j: (0, j)),
        ],
        out_specs=pl.BlockSpec((None, tm, tn), lambda b, i, j: (b, i, j)),
        scratch_shapes=[
            pltpu.VMEM((tm + halo_p, cin_x), jnp.bfloat16),
            pltpu.VMEM((tm, tn), jnp.float32),
        ],
        compiler_params=pltpu.CompilerParams(
            dimension_semantics=("parallel", "parallel", "parallel"),
            vmem_limit_bytes=40 * 1024 * 1024),
    )(flat4, flat4, wt, bt)

    if n_row_tiles * tm != l_rows:                # only possible on the fallback tiling
        out = out[:, :l_rows, :]
    return out


# ------------------------------------------------------------------- maxpool 2x2 stride 2
def _maxpool_kernel(x00, x01, x10, x11, o_ref, *, wo):
    """xij: (THo, Wo+1, C) strided window taps; o: (THo, Wo+2, C) wide-flat pooled output."""
    m = jnp.maximum(jnp.maximum(x00[...], x01[...]), jnp.maximum(x10[...], x11[...]))
    o_ref[:, 0:wo + 1, :] = m                     # column Wo is already 0 (zeroed pad cols)
    o_ref[:, wo + 1:, :] = jnp.zeros((o_ref.shape[0], 1, o_ref.shape[2]), o_ref.dtype)


def _pick_tho(ho, wo, c, cap_bytes=2 * 1024 * 1024):
    per_row = 2 * (wo + 1) * 8 * max(c, 128) * 2  # conservative padded-VMEM estimate
    for d in range(ho, 0, -1):
        if ho % d == 0 and d * per_row <= cap_bytes:
            return d
    return 1


def maxpool_wide(x_wide, h, w):
    """2x2/2 maxpool on the wide-flat layout: (N, h*(w+2), C) -> (N, (h/2)*((w/2)+2), C)."""
    n, l_rows, c = x_wide.shape
    wp = w + 2
    assert l_rows == h * wp and h % 2 == 0 and w % 2 == 0
    ho, wo = h // 2, w // 2
    wpo = wo + 2
    xv = x_wide.reshape(n, ho, 2, wo + 1, 2, c)   # free row-major reshape, no data movement
    tho = _pick_tho(ho, wo, c)

    def win_spec(s0, s1):
        return pl.BlockSpec((None, tho, None, wo + 1, None, c),
                            lambda b, i, s0=s0, s1=s1: (b, i, s0, 0, s1, 0))

    out = pl.pallas_call(
        functools.partial(_maxpool_kernel, wo=wo),
        out_shape=jax.ShapeDtypeStruct((n, ho, wpo, c), x_wide.dtype),
        grid=(n, ho // tho),
        in_specs=[win_spec(0, 0), win_spec(0, 1), win_spec(1, 0), win_spec(1, 1)],
        out_specs=pl.BlockSpec((None, tho, wpo, c), lambda b, i: (b, i, 0, 0)),
        compiler_params=pltpu.CompilerParams(
            dimension_semantics=("parallel", "parallel")),
    )(xv, xv, xv, xv)
    return out.reshape(n, ho * wpo, c)


# ------------------------------------------------------- standalone NHWC wrappers (tests)
def conv3x3(x_nhwc, weight, bias, relu):
    n, h, w, _ = x_nhwc.shape
    return from_wide(conv3x3_wide(to_wide(x_nhwc), h, w, weight, bias, relu), h, w)


def maxpool2x2(x_nhwc):
    n, h, w, _ = x_nhwc.shape
    return from_wide(maxpool_wide(to_wide(x_nhwc.astype(jnp.bfloat16)), h, w),
                     h // 2, w // 2)


# ------------------------------------------------------------------------------- model
def init_params(key):
    # TODO(synk): torchvision's pretrained VGG19 weights cannot be loaded here (no file or
    # network access); deterministic He-init stand-ins with identical shapes are used.
    params = []
    for layer in VGG19_54_CFG:
        if layer == "M":
            continue
        cin, cout, _ = layer
        key, wk = jax.random.split(key)
        std = jnp.sqrt(2.0 / (cin * 9)).astype(jnp.float32)
        wgt = jax.random.normal(wk, (cout, cin, 3, 3), dtype=jnp.float32) * std
        b = jnp.zeros((cout,), jnp.float32)
        params.append((wgt, b))
    return tuple(params)


def feature_extractor(img_nchw, params):
    """VGG19_54 forward: (N, 3, H, W) -> (N, 512, H/16, W/16)."""
    n, c, h, w = img_nchw.shape
    x = jnp.transpose(img_nchw, (0, 2, 3, 1)).astype(jnp.bfloat16)
    x = jnp.pad(x, ((0, 0), (0, 0), (0, 0), (0, (-c) % 8)))      # lane-pad image channels
    xw = to_wide(x)
    cur_h, cur_w = h, w
    pi = 0
    for layer in VGG19_54_CFG:
        if layer == "M":
            xw = maxpool_wide(xw, cur_h, cur_w)
            cur_h //= 2
            cur_w //= 2
        else:
            _, _, relu = layer
            wgt, b = params[pi]
            pi += 1
            xw = conv3x3_wide(xw, cur_h, cur_w, wgt, b, relu)
    feat = from_wide(xw, cur_h, cur_w).astype(jnp.float32)
    return jnp.transpose(feat, (0, 3, 1, 2))                     # NHWC -> NCHW


# ------------------------------------------------------------------------------- main
if __name__ == "__main__":
    key = jax.random.PRNGKey(0)
    pkey, xkey, ck1, ck2 = jax.random.split(key, 4)

    # conv kernel sanity check vs XLA conv (bf16 inputs, f32 accumulation), single row tile
    xc = jax.random.normal(ck1, (2, 8, 8, 16), dtype=jnp.float32)
    wc = jax.random.normal(ck2, (32, 16, 3, 3), dtype=jnp.float32) * 0.1
    bc = jnp.linspace(-0.5, 0.5, 32, dtype=jnp.float32)
    got = conv3x3(xc, wc, bc, relu=True).astype(jnp.float32)
    xr = xc.astype(jnp.bfloat16).astype(jnp.float32)
    wr = wc.astype(jnp.bfloat16).astype(jnp.float32)
    ref = jax.lax.conv_general_dilated(
        jnp.transpose(xr, (0, 3, 1, 2)), wr, (1, 1), ((1, 1), (1, 1)),
        precision=jax.lax.Precision.HIGHEST)
    ref = jnp.maximum(jnp.transpose(ref, (0, 2, 3, 1)) + bc, 0.0)
    assert jnp.allclose(got, ref, rtol=2e-2, atol=2e-2), "conv3x3 kernel mismatch"

    # multi-row-tile conv check (exercises the cross-tile halo-block path)
    xm = jax.random.normal(ck1, (1, 64, 32, 16), dtype=jnp.float32)
    wm = jax.random.normal(ck2, (64, 16, 3, 3), dtype=jnp.float32) * 0.05
    bm = jnp.linspace(-0.2, 0.2, 64, dtype=jnp.float32)
    gotm = conv3x3(xm, wm, bm, relu=False).astype(jnp.float32)
    xmr = xm.astype(jnp.bfloat16).astype(jnp.float32)
    wmr = wm.astype(jnp.bfloat16).astype(jnp.float32)
    refm = jax.lax.conv_general_dilated(
        jnp.transpose(xmr, (0, 3, 1, 2)), wmr, (1, 1), ((1, 1), (1, 1)),
        precision=jax.lax.Precision.HIGHEST)
    refm = jnp.transpose(refm, (0, 2, 3, 1)) + bm
    assert jnp.allclose(gotm, refm, rtol=2e-2, atol=2e-2), "multi-tile conv3x3 mismatch"

    # maxpool kernel sanity check
    xp_ = jax.random.normal(ck1, (2, 8, 8, 16), dtype=jnp.float32)
    pref = xp_.astype(jnp.bfloat16).astype(jnp.float32).reshape(
        2, 4, 2, 4, 2, 16).max(axis=(2, 4))
    gotp = maxpool2x2(xp_).astype(jnp.float32)
    assert jnp.allclose(gotp, pref), "maxpool kernel mismatch"

    # full FeatureExtractor forward (NCHW in, NCHW out, like the PyTorch module)
    params = init_params(pkey)
    img = jax.random.normal(xkey, (2, 3, 32, 32), dtype=jnp.float32)

    forward = jax.jit(feature_extractor)
    out = forward(img, params)
    jax.block_until_ready(out)

    assert out.shape == (2, 512, 2, 2), out.shape
    assert bool(jnp.all(jnp.isfinite(out)))
    print("KERNEL_OK")
</pallas_src>

<mosaic_0001>
module attributes {stable_mosaic.version = 11 : i64} {
  func.func @_conv3x3_kernel(%arg0: i32, %arg1: i32, %arg2: i32, %arg3: memref<1x1x80x16xbf16, #tpu.memory_space<vmem>>, %arg4: memref<1x1x24x16xbf16, #tpu.memory_space<vmem>>, %arg5: memref<9x16x32xbf16, #tpu.memory_space<vmem>>, %arg6: memref<1x32xf32, #tpu.memory_space<vmem>>, %arg7: memref<1x80x32xbf16, #tpu.memory_space<vmem>>, %arg8: memref<104x16xbf16, #tpu.memory_space<vmem>>, %arg9: memref<80x32xf32, #tpu.memory_space<vmem>>) attributes {dimension_semantics = [#tpu.dimension_semantics<parallel>, #tpu.dimension_semantics<parallel>, #tpu.dimension_semantics<parallel>], iteration_bounds = array<i64: 2, 1, 1>, scalar_prefetch = 0 : i64, scratch_operands = 2 : i64, tpu.core_type = #tpu.core_type<tc>, window_params = [{transform_indices = @transform_0, window_bounds = array<i64: 1, 1, 80, 16>}, {transform_indices = @transform_1, window_bounds = array<i64: 1, 1, 24, 16>}, {transform_indices = @transform_2, window_bounds = array<i64: 9, 16, 32>}, {transform_indices = @transform_3, window_bounds = array<i64: 1, 32>}, {transform_indices = @transform_4, window_bounds = array<i64: 1, 80, 32>}]} {
    %c0 = arith.constant 0 : index
    %c0_0 = arith.constant 0 : index
    %c0_1 = arith.constant 0 : index
    %c0_2 = arith.constant 0 : index
    %0 = vector.load %arg3[%c0, %c0_0, %c0_1, %c0_2] : memref<1x1x80x16xbf16, #tpu.memory_space<vmem>>, vector<1x1x80x16xbf16>
    %1 = vector.shape_cast %0 : vector<1x1x80x16xbf16> to vector<80x16xbf16>
    %c0_3 = arith.constant 0 : index
    %c0_4 = arith.constant 0 : index
    %2 = vector.load %arg8[%c0_3, %c0_4] : memref<104x16xbf16, #tpu.memory_space<vmem>>, vector<80x16xbf16>
    tpu.vector_store %arg8[%c0_3, %c0_4], %1 {strides = array<i32>} : memref<104x16xbf16, #tpu.memory_space<vmem>>, vector<80x16xbf16>,
    %c0_5 = arith.constant 0 : index
    %c0_6 = arith.constant 0 : index
    %c0_7 = arith.constant 0 : index
    %c0_8 = arith.constant 0 : index
    %3 = vector.load %arg4[%c0_5, %c0_6, %c0_7, %c0_8] : memref<1x1x24x16xbf16, #tpu.memory_space<vmem>>, vector<1x1x24x16xbf16>
    %4 = vector.shape_cast %3 : vector<1x1x24x16xbf16> to vector<24x16xbf16>
    %c80 = arith.constant 80 : index
    %c0_9 = arith.constant 0 : index
    %5 = vector.load %arg8[%c80, %c0_9] : memref<104x16xbf16, #tpu.memory_space<vmem>>, vector<24x16xbf16>
    tpu.vector_store %arg8[%c80, %c0_9], %4 {strides = array<i32>} : memref<104x16xbf16, #tpu.memory_space<vmem>>, vector<24x16xbf16>,
    %c0_10 = arith.constant 0 : index
    %c0_11 = arith.constant 0 : index
    %6 = vector.load %arg8[%c0_10, %c0_11] : memref<104x16xbf16, #tpu.memory_space<vmem>>, vector<80x16xbf16>
    %c0_12 = arith.constant 0 : index
    %c0_13 = arith.constant 0 : index
    %c0_14 = arith.constant 0 : index
    %7 = vector.load %arg5[%c0_12, %c0_13, %c0_14] : memref<9x16x32xbf16, #tpu.memory_space<vmem>>, vector<1x16x32xbf16>
    %8 = vector.shape_cast %7 : vector<1x16x32xbf16> to vector<16x32xbf16>
    %cst = arith.constant dense<0.000000e+00> : vector<80x32xf32>
    %9 = tpu.matmul %6, %8, %cst {dimension_numbers = #tpu.dot_dimension_numbers<[1], [0], [0], [1], [0, 0, 1, 1], [], []>} : vector<80x16xbf16>, vector<16x32xbf16>, vector<80x32xf32> -> vector<80x32xf32>
    %c0_15 = arith.constant 0 : index
    %c0_16 = arith.constant 0 : index
    %10 = vector.load %arg9[%c0_15, %c0_16] : memref<80x32xf32, #tpu.memory_space<vmem>>, vector<80x32xf32>
    tpu.vector_store %arg9[%c0_15, %c0_16], %9 {strides = array<i32>} : memref<80x32xf32, #tpu.memory_space<vmem>>, vector<80x32xf32>,
    %c1 = arith.constant 1 : index
    %c0_17 = arith.constant 0 : index
    %11 = vector.load %arg8[%c1, %c0_17] : memref<104x16xbf16, #tpu.memory_space<vmem>>, vector<80x16xbf16>
    %c1_18 = arith.constant 1 : index
    %c0_19 = arith.constant 0 : index
    %c0_20 = arith.constant 0 : index
    %12 = vector.load %arg5[%c1_18, %c0_19, %c0_20] : memref<9x16x32xbf16, #tpu.memory_space<vmem>>, vector<1x16x32xbf16>
    %13 = vector.shape_cast %12 : vector<1x16x32xbf16> to vector<16x32xbf16>
    %cst_21 = arith.constant dense<0.000000e+00> : vector<80x32xf32>
    %14 = tpu.matmul %11, %13, %cst_21 {dimension_numbers = #tpu.dot_dimension_numbers<[1], [0], [0], [1], [0, 0, 1, 1], [], []>} : vector<80x16xbf16>, vector<16x32xbf16>, vector<80x32xf32> -> vector<80x32xf32>
    %c0_22 = arith.constant 0 : index
    %c0_23 = arith.constant 0 : index
    %15 = vector.load %arg9[%c0_22, %c0_23] : memref<80x32xf32, #tpu.memory_space<vmem>>, vector<80x32xf32>
    %16 = arith.addf %15, %14 : vector<80x32xf32>
    %c0_24 = arith.constant 0 : index
    %c0_25 = arith.constant 0 : index
    %17 = vector.load %arg9[%c0_24, %c0_25] : memref<80x32xf32, #tpu.memory_space<vmem>>, vector<80x32xf32>
    tpu.vector_store %arg9[%c0_24, %c0_25], %16 {strides = array<i32>} : memref<80x32xf32, #tpu.memory_space<vmem>>, vector<80x32xf32>,
    %c2 = arith.constant 2 : index
    %c0_26 = arith.constant 0 : index
    %18 = vector.load %arg8[%c2, %c0_26] : memref<104x16xbf16, #tpu.memory_space<vmem>>, vector<80x16xbf16>
    %c2_27 = arith.constant 2 : index
    %c0_28 = arith.constant 0 : index
    %c0_29 = arith.constant 0 : index
    %19 = vector.load %arg5[%c2_27, %c0_28, %c0_29] : memref<9x16x32xbf16, #tpu.memory_space<vmem>>, vector<1x16x32xbf16>
    %20 = vector.shape_cast %19 : vector<1x16x32xbf16> to vector<16x32xbf16>
    %cst_30 = arith.constant dense<0.000000e+00> : vector<80x32xf32>
    %21 = tpu.matmul %18, %20, %cst_30 {dimension_numbers = #tpu.dot_dimension_numbers<[1], [0], [0], [1], [0, 0, 1, 1], [], []>} : vector<80x16xbf16>, vector<16x32xbf16>, vector<80x32xf32> -> vector<80x32xf32>
    %c0_31 = arith.constant 0 : index
    %c0_32 = arith.constant 0 : index
    %22 = vector.load %arg9[%c0_31, %c0_32] : memref<80x32xf32, #tpu.memory_space<vmem>>, vector<80x32xf32>
    %23 = arith.addf %22, %21 : vector<80x32xf32>
    %c0_33 = arith.constant 0 : index
    %c0_34 = arith.constant 0 : index
    %24 = vector.load %arg9[%c0_33, %c0_34] : memref<80x32xf32, #tpu.memory_space<vmem>>, vector<80x32xf32>
    tpu.vector_store %arg9[%c0_33, %c0_34], %23 {strides = array<i32>} : memref<80x32xf32, #tpu.memory_space<vmem>>, vector<80x32xf32>,
    %c10 = arith.constant 10 : index
    %c0_35 = arith.constant 0 : index
    %25 = vector.load %arg8[%c10, %c0_35] : memref<104x16xbf16, #tpu.memory_space<vmem>>, vector<80x16xbf16>
    %c3 = arith.constant 3 : index
    %c0_36 = arith.constant 0 : index
    %c0_37 = arith.constant 0 : index
    %26 = vector.load %arg5[%c3, %c0_36, %c0_37] : memref<9x16x32xbf16, #tpu.memory_space<vmem>>, vector<1x16x32xbf16>
    %27 = vector.shape_cast %26 : vector<1x16x32xbf16> to vector<16x32xbf16>
    %cst_38 = arith.constant dense<0.000000e+00> : vector<80x32xf32>
    %28 = tpu.matmul %25, %27, %cst_38 {dimension_numbers = #tpu.dot_dimension_numbers<[1], [0], [0], [1], [0, 0, 1, 1], [], []>} : vector<80x16xbf16>, vector<16x32xbf16>, vector<80x32xf32> -> vector<80x32xf32>
    %c0_39 = arith.constant 0 : index
    %c0_40 = arith.constant 0 : index
    %29 = vector.load %arg9[%c0_39, %c0_40] : memref<80x32xf32, #tpu.memory_space<vmem>>, vector<80x32xf32>
    %30 = arith.addf %29, %28 : vector<80x32xf32>
    %c0_41 = arith.constant 0 : index
    %c0_42 = arith.constant 0 : index
    %31 = vector.load %arg9[%c0_41, %c0_42] : memref<80x32xf32, #tpu.memory_space<vmem>>, vector<80x32xf32>
    tpu.vector_store %arg9[%c0_41, %c0_42], %30 {strides = array<i32>} : memref<80x32xf32, #tpu.memory_space<vmem>>, vector<80x32xf32>,
    %c11 = arith.constant 11 : index
    %c0_43 = arith.constant 0 : index
    %32 = vector.load %arg8[%c11, %c0_43] : memref<104x16xbf16, #tpu.memory_space<vmem>>, vector<80x16xbf16>
    %c4 = arith.constant 4 : index
    %c0_44 = arith.constant 0 : index
    %c0_45 = arith.constant 0 : index
    %33 = vector.load %arg5[%c4, %c0_44, %c0_45] : memref<9x16x32xbf16, #tpu.memory_space<vmem>>, vector<1x16x32xbf16>
    %34 = vector.shape_cast %33 : vector<1x16x32xbf16> to vector<16x32xbf16>
    %cst_46 = arith.constant dense<0.000000e+00> : vector<80x32xf32>
    %35 = tpu.matmul %32, %34, %cst_46 {dimension_numbers = #tpu.dot_dimension_numbers<[1], [0], [0], [1], [0, 0, 1, 1], [], []>} : vector<80x16xbf16>, vector<16x32xbf16>, vector<80x32xf32> -> vector<80x32xf32>
    %c0_47 = arith.constant 0 : index
    %c0_48 = arith.constant 0 : index
    %36 = vector.load %arg9[%c0_47, %c0_48] : memref<80x32xf32, #tpu.memory_space<vmem>>, vector<80x32xf32>
    %37 = arith.addf %36, %35 : vector<80x32xf32>
    %c0_49 = arith.constant 0 : index
    %c0_50 = arith.constant 0 : index
    %38 = vector.load %arg9[%c0_49, %c0_50] : memref<80x32xf32, #tpu.memory_space<vmem>>, vector<80x32xf32>
    tpu.vector_store %arg9[%c0_49, %c0_50], %37 {strides = array<i32>} : memref<80x32xf32, #tpu.memory_space<vmem>>, vector<80x32xf32>,
    %c12 = arith.constant 12 : index
    %c0_51 = arith.constant 0 : index
    %39 = vector.load %arg8[%c12, %c0_51] : memref<104x16xbf16, #tpu.memory_space<vmem>>, vector<80x16xbf16>
    %c5 = arith.constant 5 : index
    %c0_52 = arith.constant 0 : index
    %c0_53 = arith.constant 0 : index
    %40 = vector.load %arg5[%c5, %c0_52, %c0_53] : memref<9x16x32xbf16, #tpu.memory_space<vmem>>, vector<1x16x32xbf16>
    %41 = vector.shape_cast %40 : vector<1x16x32xbf16> to vector<16x32xbf16>
    %cst_54 = arith.constant dense<0.000000e+00> : vector<80x32xf32>
    %42 = tpu.matmul %39, %41, %cst_54 {dimension_numbers = #tpu.dot_dimension_numbers<[1], [0], [0], [1], [0, 0, 1, 1], [], []>} : vector<80x16xbf16>, vector<16x32xbf16>, vector<80x32xf32> -> vector<80x32xf32>
    %c0_55 = arith.constant 0 : index
    %c0_56 = arith.constant 0 : index
    %43 = vector.load %arg9[%c0_55, %c0_56] : memref<80x32xf32, #tpu.memory_space<vmem>>, vector<80x32xf32>
    %44 = arith.addf %43, %42 : vector<80x32xf32>
    %c0_57 = arith.constant 0 : index
    %c0_58 = arith.constant 0 : index
    %45 = vector.load %arg9[%c0_57, %c0_58] : memref<80x32xf32, #tpu.memory_space<vmem>>, vector<80x32xf32>
    tpu.vector_store %arg9[%c0_57, %c0_58], %44 {strides = array<i32>} : memref<80x32xf32, #tpu.memory_space<vmem>>, vector<80x32xf32>,
    %c20 = arith.constant 20 : index
    %c0_59 = arith.constant 0 : index
    %46 = vector.load %arg8[%c20, %c0_59] : memref<104x16xbf16, #tpu.memory_space<vmem>>, vector<80x16xbf16>
    %c6 = arith.constant 6 : index
    %c0_60 = arith.constant 0 : index
    %c0_61 = arith.constant 0 : index
    %47 = vector.load %arg5[%c6, %c0_60, %c0_61] : memref<9x16x32xbf16, #tpu.memory_space<vmem>>, vector<1x16x32xbf16>
    %48 = vector.shape_cast %47 : vector<1x16x32xbf16> to vector<16x32xbf16>
    %cst_62 = arith.constant dense<0.000000e+00> : vector<80x32xf32>
    %49 = tpu.matmul %46, %48, %cst_62 {dimension_numbers = #tpu.dot_dimension_numbers<[1], [0], [0], [1], [0, 0, 1, 1], [], []>} : vector<80x16xbf16>, vector<16x32xbf16>, vector<80x32xf32> -> vector<80x32xf32>
    %c0_63 = arith.constant 0 : index
    %c0_64 = arith.constant 0 : index
    %50 = vector.load %arg9[%c0_63, %c0_64] : memref<80x32xf32, #tpu.memory_space<vmem>>, vector<80x32xf32>
    %51 = arith.addf %50, %49 : vector<80x32xf32>
    %c0_65 = arith.constant 0 : index
    %c0_66 = arith.constant 0 : index
    %52 = vector.load %arg9[%c0_65, %c0_66] : memref<80x32xf32, #tpu.memory_space<vmem>>, vector<80x32xf32>
    tpu.vector_store %arg9[%c0_65, %c0_66], %51 {strides = array<i32>} : memref<80x32xf32, #tpu.memory_space<vmem>>, vector<80x32xf32>,
    %c21 = arith.constant 21 : index
    %c0_67 = arith.constant 0 : index
    %53 = vector.load %arg8[%c21, %c0_67] : memref<104x16xbf16, #tpu.memory_space<vmem>>, vector<80x16xbf16>
    %c7 = arith.constant 7 : index
    %c0_68 = arith.constant 0 : index
    %c0_69 = arith.constant 0 : index
    %54 = vector.load %arg5[%c7, %c0_68, %c0_69] : memref<9x16x32xbf16, #tpu.memory_space<vmem>>, vector<1x16x32xbf16>
    %55 = vector.shape_cast %54 : vector<1x16x32xbf16> to vector<16x32xbf16>
    %cst_70 = arith.constant dense<0.000000e+00> : vector<80x32xf32>
    %56 = tpu.matmul %53, %55, %cst_70 {dimension_numbers = #tpu.dot_dimension_numbers<[1], [0], [0], [1], [0, 0, 1, 1], [], []>} : vector<80x16xbf16>, vector<16x32xbf16>, vector<80x32xf32> -> vector<80x32xf32>
    %c0_71 = arith.constant 0 : index
    %c0_72 = arith.constant 0 : index
    %57 = vector.load %arg9[%c0_71, %c0_72] : memref<80x32xf32, #tpu.memory_space<vmem>>, vector<80x32xf32>
    %58 = arith.addf %57, %56 : vector<80x32xf32>
    %c0_73 = arith.constant 0 : index
    %c0_74 = arith.constant 0 : index
    %59 = vector.load %arg9[%c0_73, %c0_74] : memref<80x32xf32, #tpu.memory_space<vmem>>, vector<80x32xf32>
    tpu.vector_store %arg9[%c0_73, %c0_74], %58 {strides = array<i32>} : memref<80x32xf32, #tpu.memory_space<vmem>>, vector<80x32xf32>,
    %c22 = arith.constant 22 : index
    %c0_75 = arith.constant 0 : index
    %60 = vector.load %arg8[%c22, %c0_75] : memref<104x16xbf16, #tpu.memory_space<vmem>>, vector<80x16xbf16>
    %c8 = arith.constant 8 : index
    %c0_76 = arith.constant 0 : index
    %c0_77 = arith.constant 0 : index
    %61 = vector.load %arg5[%c8, %c0_76, %c0_77] : memref<9x16x32xbf16, #tpu.memory_space<vmem>>, vector<1x16x32xbf16>
    %62 = vector.shape_cast %61 : vector<1x16x32xbf16> to vector<16x32xbf16>
    %cst_78 = arith.constant dense<0.000000e+00> : vector<80x32xf32>
    %63 = tpu.matmul %60, %62, %cst_78 {dimension_numbers = #tpu.dot_dimension_numbers<[1], [0], [0], [1], [0, 0, 1, 1], [], []>} : vector<80x16xbf16>, vector<16x32xbf16>, vector<80x32xf32> -> vector<80x32xf32>
    %c0_79 = arith.constant 0 : index
    %c0_80 = arith.constant 0 : index
    %64 = vector.load %arg9[%c0_79, %c0_80] : memref<80x32xf32, #tpu.memory_space<vmem>>, vector<80x32xf32>
    %65 = arith.addf %64, %63 : vector<80x32xf32>
    %c0_81 = arith.constant 0 : index
    %c0_82 = arith.constant 0 : index
    %66 = vector.load %arg9[%c0_81, %c0_82] : memref<80x32xf32, #tpu.memory_space<vmem>>, vector<80x32xf32>
    tpu.vector_store %arg9[%c0_81, %c0_82], %65 {strides = array<i32>} : memref<80x32xf32, #tpu.memory_space<vmem>>, vector<80x32xf32>,
    %c0_83 = arith.constant 0 : index
    %c0_84 = arith.constant 0 : index
    %67 = vector.load %arg9[%c0_83, %c0_84] : memref<80x32xf32, #tpu.memory_space<vmem>>, vector<80x32xf32>
    %c0_85 = arith.constant 0 : index
    %c0_86 = arith.constant 0 : index
    %68 = vector.load %arg6[%c0_85, %c0_86] : memref<1x32xf32, #tpu.memory_space<vmem>>, vector<1x32xf32>
    %69 = vector.broadcast %68 : vector<1x32xf32> to vector<80x32xf32>
    %70 = arith.addf %67, %69 : vector<80x32xf32>
    %cst_87 = arith.constant 0.000000e+00 : f32
    %71 = vector.broadcast %cst_87 : f32 to vector<80x32xf32>
    %72 = arith.maximumf %70, %71 : vector<80x32xf32>
    %73 = tpu.iota {dimensions = array<i32: 0>} : vector<80x1xi32>
    %c80_i32 = arith.constant 80 : i32
    %74 = arith.muli %arg1, %c80_i32 : i32
    %75 = vector.broadcast %74 : i32 to vector<80x1xi32>
    %76 = arith.addi %73, %75 : vector<80x1xi32>
    %c10_i32 = arith.constant 10 : i32
    %c0_i32 = arith.constant 0 : i32
    %77 = arith.cmpi eq, %c10_i32, %c0_i32 : i32
    %c1_i32 = arith.constant 1 : i32
    %78 = arith.select %77, %c1_i32, %c10_i32 : i32
    %79 = vector.broadcast %78 : i32 to vector<80x1xi32>
    %80 = arith.remsi %76, %79 : vector<80x1xi32>
    %c0_i32_88 = arith.constant 0 : i32
    %81 = vector.broadcast %c0_i32_88 : i32 to vector<80x1xi32>
    %82 = arith.cmpi ne, %80, %81 : vector<80x1xi32>
    %c0_i32_89 = arith.constant 0 : i32
    %83 = vector.broadcast %c0_i32_89 : i32 to vector<80x1xi32>
    %84 = arith.cmpi slt, %80, %83 : vector<80x1xi32>
    %c0_i32_90 = arith.constant 0 : i32
    %85 = arith.cmpi slt, %78, %c0_i32_90 : i32
    %86 = vector.broadcast %85 : i1 to vector<80x1xi1>
    %87 = vector.broadcast %86 : vector<80x1xi1> to vector<80x1xi1>
    %88 = arith.xori %84, %87 : vector<80x1xi1>
    %89 = arith.andi %88, %82 : vector<80x1xi1>
    %90 = vector.broadcast %78 : i32 to vector<80x1xi32>
    %91 = arith.addi %80, %90 : vector<80x1xi32>
    %92 = arith.select %89, %91, %80 : vector<80x1xi1>, vector<80x1xi32>
    %c8_i32 = arith.constant 8 : i32
    %93 = vector.broadcast %c8_i32 : i32 to vector<80x1xi32>
    %94 = arith.cmpi slt, %92, %93 : vector<80x1xi32>
    %cst_91 = arith.constant 0.000000e+00 : f32
    %95 = vector.shape_cast %94 : vector<80x1xi1> to vector<80x1xi1>
    %96 = vector.broadcast %95 : vector<80x1xi1> to vector<80x32xi1>
    %97 = vector.broadcast %cst_91 : f32 to vector<80x32xf32>
    %98 = arith.select %96, %72, %97 : vector<80x32xi1>, vector<80x32xf32>
    %99 = arith.truncf %98 : vector<80x32xf32> to vector<80x32xbf16>
    %c0_92 = arith.constant 0 : index
    %c0_93 = arith.constant 0 : index
    %c0_94 = arith.constant 0 : index
    %100 = vector.load %arg7[%c0_92, %c0_93, %c0_94] : memref<1x80x32xbf16, #tpu.memory_space<vmem>>, vector<1x80x32xbf16>
    %101 = vector.shape_cast %100 : vector<1x80x32xbf16> to vector<80x32xbf16>
    %102 = vector.shape_cast %99 : vector<80x32xbf16> to vector<1x80x32xbf16>
    tpu.vector_store %arg7[%c0_92, %c0_93, %c0_94], %102 {strides = array<i32>} : memref<1x80x32xbf16, #tpu.memory_space<vmem>>, vector<1x80x32xbf16>,
    return
  }
  func.func @transform_0(%arg0: i32, %arg1: i32, %arg2: i32) -> (i32, i32, i32, i32) {
    %c0_i32 = arith.constant 0 : i32
    %c0_i32_0 = arith.constant 0 : i32
    %c0_i32_1 = arith.constant 0 : i32
    return %arg0, %arg1, %c0_i32, %c0_i32_0 : i32, i32, i32, i32
  }
  func.func @transform_1(%arg0: i32, %arg1: i32, %arg2: i32) -> (i32, i32, i32, i32) {
    %c1_i32 = arith.constant 1 : i32
    %0 = arith.addi %arg1, %c1_i32 : i32
    %c0_i32 = arith.constant 0 : i32
    %c0_i32_0 = arith.constant 0 : i32
    %c0_i32_1 = arith.constant 0 : i32
    return %arg0, %0, %c0_i32, %c0_i32_0 : i32, i32, i32, i32
  }
  func.func @transform_2(%arg0: i32, %arg1: i32, %arg2: i32) -> (i32, i32, i32) {
    %c0_i32 = arith.constant 0 : i32
    %c0_i32_0 = arith.constant 0 : i32
    %c0_i32_1 = arith.constant 0 : i32
    return %c0_i32, %c0_i32_0, %arg2 : i32, i32, i32
  }
  func.func @transform_3(%arg0: i32, %arg1: i32, %arg2: i32) -> (i32, i32) {
    %c0_i32 = arith.constant 0 : i32
    %c0_i32_0 = arith.constant 0 : i32
    return %c0_i32, %arg2 : i32, i32
  }
  func.func @transform_4(%arg0: i32, %arg1: i32, %arg2: i32) -> (i32, i32, i32) {
    %c0_i32 = arith.constant 0 : i32
    return %arg0, %arg1, %arg2 : i32, i32, i32
  }
}

</mosaic_0001>

<bundles_post_ra>
// kernel: tpu_custom_call.1
= control target key start
LH: loop header
LB: loop body
LE: loop exit
PB: predicated region body
PF: predicated region fallthrough
CT: control target
= control target key end

     0   :  { %s3069_s15 = smov 0   ;;  %s3071_s16 = smov 0   ;;  %s3701_s0 = inlined_call_operand.vmem [shape: bf16[2,2,80,16], index: 0, kind: input, shape index: {}]   ;;  %s3702_s1 = inlined_call_operand.vmem [shape: bf16[2,2,80,16], index: 1, kind: input, shape index: {}]   ;;  %s3703_s2 = inlined_call_operand.vmem [shape: bf16[9,16,32], index: 2, kind: input, shape index: {}]   ;;  %s3704_s3 = inlined_call_operand.vmem [shape: f32[1,32], index: 3, kind: input, shape index: {}]   ;;  %s3705_s4 = inlined_call_operand.vmem [shape: bf16[2,80,32], index: 4, kind: output, shape index: {}]  }
   0x1   :  { %s3073_s17 = smov 0  }
   0x2 LB: > { %s33_s18 = sadd.s32 1, %s3036_s16  ;;  %p2500_p0 = scmp.ge.s32.totalorder %s3040_s17, 1  ;;  %s3040_s17 = sphi %s3073_s17, %s14_s17   ;;  %s3036_s16 = sphi %s3071_s16, %s3733_s16   ;;  %s3032_s15 = sphi %s3069_s15, %s3732_s15  }
   0x3   : > { %p35_p1 = scmp.ge.s32.totalorder %s33_s18, 2  ;;  %p228_p2 = scmp.lt.s32.totalorder %s3040_s17, 3 }
   0x5   : > { %s3735_s18 = smov (%p35_p1, %s33_s18), 0  ;;  %p229_p3 = pnand %p2500_p0, %p228_p2 }
   0x6   : > { %p282_p4 = scmp.lt.s32.totalorder (!%p229_p3), %s3032_s15, 1 }
   0x7   : > { %232 = sbr.rel (%p229_p3) target bundleno = 420 (0x1a4), region = 36 }
   0xc   : > { %v2956_v0 = vld [vmem:[%s3703_s2] sm:$0xff]   ;;  %v3042_v1 = vmov 0.0   ;;  %vm3043_vm0 = vmmov 0   ;;  %s3737_s15 = smov (!%p282_p4, %s3032_s15), 1  ;;  %vm333_vm1 = vcmask 125952   ;;  %vm393_vm2 = vcmask 130048  }
   0xd   : > { %2904 = vmatprep.subr.bf16.mxu1 %v3042_v1  ;;  %2706 = vmatprep.subr.bf16.mxu0 %v3042_v1  ;;  %s2906_s21 = smul.u32 80, %s3737_s15  ;;  %v2959_v15 = vld [vmem:[%s3703_s2 + $0x8] sm:$0xff]   ;;  %v2960_v16 = vld [vmem:[%s3703_s2 + $0x10] sm:$0xff]   ;;  %vm535_vm3 = vsmask.f32 7424  ;;  %v2966_v34 = vld [vmem:[%s3703_s2 + $0x18] sm:$0xff]  }
   0xe   : > { %2905 = vmatpush3.bf16.msra.mxu1 %v2956_v0  ;;  %2707 = vmatpush3.bf16.msra.mxu0 %v2956_v0  ;;  %vm746_vm4 = vcmask 1046528   ;;  %v2970_v42 = vld [vmem:[%s3703_s2 + $0x20] sm:$0xff]   ;;  %vm1101_vm5 = vsmask.f32 6400  ;;  %vm1321_vm6 = vcmask 1045504   ;;  %vm1896_vm8 = vcmask 1044480  }
   0xf   : > { %2708 = vmatprep.mubr.msk.bf16.mxu0 %vm3043_vm0, %v3042_v1  ;;  %2720 = vmatprep.mubr.msk.bf16.mxu1 %vm3043_vm0, %v3042_v1  ;;  %s290_s24 = scalar_lea.vmem %s3701_s0, %s2906_s21  ;;  %s2641_s25 = sadd.s32 40, %s2906_s21  ;;  %vm1676_vm7 = vsmask.f32 5376  ;;  %vm482_vm9 = vcmask 261120  }
  0x10   : > { %2728 = vmatprep.subr.bf16.mxu1 %v3042_v1  ;;  %2750 = vmatprep.subr.bf16.mxu0 %v3042_v1  ;;  %v323_v2 = vld [vmem:[%s290_s24] sm:$0xf]  ;;  %v324_v3 = vld [vmem:[%s290_s24 + $0x4] sm:$0xf]  ;;  %v329_v4 = vld [vmem:[%s290_s24 + $0x18] sm:$0xf]  ;;  %s300_s28 = scalar_lea.vmem %s3702_s1, %s2641_s25 }
  0x11   : > { %334 = vst.msk [vmem:[#allocation2] sm:$0xf] %vm333_vm1, %v323_v2  ;;  %335 = vst.msk [vmem:[#allocation2 + $0x4] sm:$0xf] %vm333_vm1, %v324_v3  ;;  %v330_v5 = vld [vmem:[%s290_s24 + $0x1c] sm:$0xf] }
  0x12   : > { %340 = vst.msk [vmem:[#allocation2 + $0x18] sm:$0xf] %vm333_vm1, %v329_v4  ;;  %v325_v6 = vld [vmem:[%s290_s24 + $0x8] sm:$0xf]  ;;  %v326_v7 = vld [vmem:[%s290_s24 + $0xc] sm:$0xf] }
  0x13   : > { %341 = vst.msk [vmem:[#allocation2 + $0x1c] sm:$0xf] %vm333_vm1, %v330_v5  ;;  %336 = vst.msk [vmem:[#allocation2 + $0x8] sm:$0xf] %vm333_vm1, %v325_v6  ;;  %v331_v8 = vld [vmem:[%s290_s24 + $0x20] sm:$0xf] }
  0x14   : > { %337 = vst.msk [vmem:[#allocation2 + $0xc] sm:$0xf] %vm333_vm1, %v326_v7  ;;  %v332_v9 = vld [vmem:[%s290_s24 + $0x24] sm:$0xf]  ;;  %v327_v10 = vld [vmem:[%s290_s24 + $0x10] sm:$0xf] }
  0x15   : > { %342 = vst.msk [vmem:[#allocation2 + $0x20] sm:$0xf] %vm333_vm1, %v331_v8  ;;  %343 = vst.msk [vmem:[#allocation2 + $0x24] sm:$0xf] %vm333_vm1, %v332_v9  ;;  %v328_v11 = vld [vmem:[%s290_s24 + $0x14] sm:$0xf] }
  0x16   : > { %338 = vst.msk [vmem:[#allocation2 + $0x10] sm:$0xf] %vm333_vm1, %v327_v10  ;;  %v344_v12 = vld [vmem:[%s300_s28] sm:$0xf]  ;;  %339 = vst.msk [vmem:[#allocation2 + $0x14] sm:$0xf] %vm333_vm1, %v328_v11 }
  0x17   : > { %347 = vst.msk [vmem:[#allocation2 + $0x28] sm:$0xf] %vm333_vm1, %v344_v12  ;;  %v345_v13 = vld [vmem:[%s300_s28 + $0x4] sm:$0xf]  ;;  %v346_v14 = vld [vmem:[%s300_s28 + $0x8] sm:$0xf] }
  0x18   : > { %348 = vst.msk [vmem:[#allocation2 + $0x2c] sm:$0xf] %vm333_vm1, %v345_v13  ;;  %349 = vst.msk [vmem:[#allocation2 + $0x30] sm:$0xf] %vm333_vm1, %v346_v14  ;;  %v2957_v17 = vld [vmem:[#allocation2] sm:$0xff]   ;;  %s2908_s25 = smul.u32 40, %s3737_s15 }
  0x19   : > { %2709 = vmatmul.mubr.msk.bf16.vlgmr.msra.gmra.mxu0 %vm393_vm2, %v2957_v17  ;;  %v2964_v20 = vld [vmem:[#allocation2] sm:$0xff]  }
  0x1a   : > { %v2958_v18 = vld [vmem:[#allocation2 + $0x18] sm:$0xff]   ;;  %2751 = vmatpush3.bf16.msra.mxu0 %v2960_v16  ;;  %2712 = vmatprep.mubr.msk.bf16.mxu0 %vm3043_vm0, %v3042_v1  ;;  %v537_v23 = vshrl.u32 %v2964_v20, 16  ;;  %v539_v24 = vshll.u32 %v2964_v20, 16  ;;  %v2968_v31 = vld [vmem:[#allocation2] sm:$0xfe]   ;;  %s3535_s27 = scalar_lea.vmem %s3705_s4, %s2908_s25 }
  0x1b   : > { %2721 = vmatmul.mubr.msk.bf16.vlgmr.msra.gmra.mxu1 %vm393_vm2, %v2958_v18  ;;  %v2961_v19 = vld [vmem:[#allocation2 + $0x8] sm:$0xff]   ;;  %2794 = vmatprep.subr.bf16.mxu0 %v3042_v1  ;;  %v747_v37 = vrot.slane %v2968_v31, 1  ;;  %v2971_v41 = vld [vmem:[#allocation2 + $0x18] sm:$0xff]  }
  0x1c   : > { %2729 = vmatpush3.bf16.msra.mxu1 %v2959_v15  ;;  %2724 = vmatprep.mubr.msk.bf16.mxu1 %vm3043_vm0, %v3042_v1  ;;  %v2965_v21 = vld [vmem:[#allocation2 + $0x8] sm:$0xff]   ;;  %v2962_v22 = vld [vmem:[#allocation2 + $0x20] sm:$0xff]   ;;  %v541_v26 = vrot.slane %v539_v24, 1  ;;  %v560_v47 = vshll.u32 %v2971_v41, 16  ;;  %v564_v53 = vshrl.u32 %v2971_v41, 16  ;;  %v2974_v55 = vld [vmem:[#allocation2 + $0x18] sm:$0xff]  }
  0x1d   : > { %2772 = vmatprep.subr.bf16.mxu1 %v3042_v1  ;;  %v544_v25 = vshll.u32 %v2965_v21, 16  ;;  %v2967_v29 = vld [vmem:[#allocation2 + $0x10] sm:$0xff]   ;;  %v2969_v32 = vld [vmem:[#allocation2 + $0x8] sm:$0xff]   ;;  %v548_v35 = vshrl.u32 %v2965_v21, 16  ;;  %v2973_v49 = vld [vmem:[#allocation2 + $0x20] sm:$0xff]   ;;  %v752_v57 = vrot.slane %v2974_v55, 1 }
  0x1e   : > { %v542_v27 = vor.u32 %v541_v26, %v537_v23  ;;  %v2963_v30 = vld [vmem:[#allocation2 + $0x10] sm:$0xff]   ;;  %v552_v36 = vshll.u32 %v2967_v29, 16  ;;  %v748_v38 = vrot.slane %v2969_v32, 1  ;;  %v556_v46 = vshrl.u32 %v2967_v29, 16  ;;  %v2976_v62 = vld [vmem:[#allocation2 + $0x20] sm:$0xff]   ;;  %v2980_v21 = vld [vmem:[%s3703_s2 + $0x28] sm:$0xff]  }
  0x1f   : > { %v546_v28 = vrot.slane %v544_v25, 1  ;;  %v2972_v44 = vld [vmem:[#allocation2 + $0x10] sm:$0xff]   ;;  %v562_v51 = vrot.slane %v560_v47, 1  ;;  %v568_v54 = vshll.u32 %v2973_v49, 16  ;;  %v572_v0 = vshrl.u32 %v2973_v49, 16 }
  0x20   : > { %v554_v40 = vrot.slane %v552_v36, 1  ;;  %v749_v43 = vsel %vm746_vm4, %v747_v37, %v748_v38  ;;  %v750_v48 = vrot.slane %v2972_v44, 1  ;;  %v2975_v60 = vld [vmem:[#allocation2 + $0x28] ss:$0 sps:$4 sm:$0x11]   ;;  %v754_v3 = vrot.slane %v2976_v62, 1 }
  0x21   : > { %2713 = vmatmul.mubr.msk.bf16.gmra.mxu0 %vm393_vm2, %v2961_v19  ;;  %v547_v33 = vsel %vm535_vm3, %v542_v27, %v546_v28  ;;  %v550_v39 = vor.u32 %v548_v35, %v546_v28  ;;  %v566_v58 = vor.u32 %v564_v53, %v562_v51  ;;  %v570_v59 = vrot.slane %v568_v54, 1  ;;  %v2977_v6 = vld [vmem:[#allocation2 + $0x28] ss:$0 sps:$4 sm:$0x11]   ;;  %v2979_v7 = vld [vmem:[#allocation2 + $0xc] sm:$0xff]   ;;  %v2986_v20 = vld [vmem:[#allocation2 + $0x14] sm:$0xff]  }
  0x22   : > { %2716 = vmatprep.mubr.msk.bf16.mxu0 %vm3043_vm0, %v3042_v1  ;;  %v558_v50 = vor.u32 %v556_v46, %v554_v40  ;;  %v751_v52 = vsel %vm746_vm4, %v748_v38, %v750_v48  ;;  %v753_v61 = vsel %vm746_vm4, %v750_v48, %v752_v57  ;;  %v576_v2 = vshll.u32 %v2975_v60, 16  ;;  %v2983_v8 = vld [vmem:[#allocation2 + $0xc] sm:$0xff]   ;;  %v2982_v10 = vld [vmem:[#allocation2 + $0x4] sm:$0xfe]   ;;  %v2981_v28 = vld [vmem:[#allocation2 + $0x14] sm:$0xff]  }
  0x23   : > { %2725 = vmatmul.mubr.msk.bf16.gmra.mxu1 %vm393_vm2, %v2962_v22  ;;  %v555_v45 = vsel %vm535_vm3, %v550_v39, %v554_v40  ;;  %v571_v63 = vsel %vm535_vm3, %v566_v58, %v570_v59  ;;  %v574_v4 = vor.u32 %v572_v0, %v570_v59  ;;  %v755_v9 = vsel %vm746_vm4, %v752_v57, %v754_v3  ;;  %v2978_v12 = vld [vmem:[#allocation2 + $0x4] sm:$0xfe]   ;;  %v2984_v35 = vld [vmem:[%s3703_s2 + $0x30] sm:$0xff]   ;;  %v2988_v38 = vld [vmem:[#allocation2 + $0x1c] sm:$0xff]  }
  0x24   : > { %2730 = vmatprep.mubr.msk.bf16.mxu1 %vm3043_vm0, %v3042_v1  ;;  %v563_v56 = vsel %vm535_vm3, %v558_v50, %v562_v51  ;;  %v578_v5 = vrot.slane %v576_v2, 1  ;;  %v1111_v13 = vshrl.u32 %v2983_v8, 16  ;;  %v1114_v14 = vshll.u32 %v2983_v8, 16  ;;  %v2985_v40 = vld [vmem:[#allocation2 + $0x1c] sm:$0xff]   ;;  %v2990_v48 = vld [vmem:[#allocation2 + $0x24] sm:$0xff]  }
  0x25   : > { %v756_v15 = vrot.slane %v2977_v6, 1  ;;  %v1103_v16 = vshrl.u32 %v2982_v10, 16  ;;  %v1106_v17 = vshll.u32 %v2982_v10, 16  ;;  %v924_v18 = vrot.slane %v2978_v12, 1  ;;  %v2987_v50 = vld [vmem:[#allocation2 + $0x24] sm:$0xff]  }
  0x26   : > { %v579_v11 = vsel %vm535_vm3, %v574_v4, %v578_v5  ;;  %v925_v19 = vrot.slane %v2979_v7, 1  ;;  %v1113_v22 = vrot.slane %v1111_v13, 1  ;;  %v1116_v23 = vrot.slane %v1114_v14, 2  ;;  %v2991_v58 = vld [vmem:[#allocation2 + $0x2c] ss:$0 sps:$4 sm:$0x33]  }
  0x27   : > { %v757_v24 = vsel %vm746_vm4, %v754_v3, %v756_v15  ;;  %v1105_v25 = vrot.slane %v1103_v16, 1  ;;  %v1108_v26 = vrot.slane %v1106_v17, 2  ;;  %v1120_v31 = vshrl.u32 %v2986_v20, 16  ;;  %v2989_v60 = vld [vmem:[#allocation2 + $0x2c] ss:$0 sps:$4 sm:$0x11]  }
  0x28   : > { %v926_v27 = vsel %vm746_vm4, %v924_v18, %v925_v19  ;;  %v1123_v32 = vshll.u32 %v2986_v20, 16  ;;  %v929_v44 = vrot.slane %v2985_v40, 1  ;;  %v1141_v53 = vshll.u32 %v2990_v48, 16  ;;  %v2992_v6 = vld [vmem:[#allocation2 + $0x4] sm:$0xfc]   ;;  %v2993_v7 = vld [vmem:[#allocation2 + $0xc] sm:$0xff]  }
  0x29   : > { %2717 = vmatmul.mubr.msk.bf16.gmra.mxu0 %vm393_vm2, %v2963_v30  ;;  %v1109_v29 = vor.u32 %v1108_v26, %v1105_v25  ;;  %v1117_v30 = vor.u32 %v1116_v23, %v1113_v22  ;;  %v1122_v36 = vrot.slane %v1120_v31, 1  ;;  %v931_v54 = vrot.slane %v2987_v50, 1  ;;  %v2996_v12 = vld [vmem:[#allocation2 + $0x8] sm:$0xfc]   ;;  %v2997_v13 = vld [vmem:[#allocation2 + $0x10] sm:$0xff]   ;;  %v2994_v15 = vld [vmem:[%s3703_s2 + $0x38] sm:$0xff]  }
  0x2a   : > { %2752 = vmatprep.mubr.msk.bf16.mxu0 %vm3043_vm0, %v3042_v1  ;;  %v1125_v37 = vrot.slane %v1123_v32, 2  ;;  %v1143_v57 = vrot.slane %v1141_v53, 2  ;;  %v1147_v62 = vshrl.u32 %v2991_v58, 16  ;;  %v933_v0 = vrot.slane %v2989_v60, 1  ;;  %v2995_v16 = vld [vmem:[#allocation2 + $0x14] sm:$0xff]  }
  0x2b   : > { %2731 = vmatmul.mubr.msk.bf16.vlgmr.msra.gmra.mxu1 %vm393_vm2, %v547_v33  ;;  %v927_v33 = vrot.slane %v2981_v28, 1  ;;  %v932_v59 = vsel %vm746_vm4, %v929_v44, %v931_v54  ;;  %v1323_v10 = vrot.slane %v2993_v7, 2  ;;  %v1499_v17 = vrot.slane %v2996_v12, 2  ;;  %v3000_v22 = vld [vmem:[#allocation2 + $0x18] sm:$0xff]   ;;  %v3002_v28 = vld [vmem:[#allocation2 + $0x20] sm:$0xff]   ;;  %v3010_v60 = vld [vmem:[#allocation2 + $0x10] sm:$0xff]  }
  0x2c   : > { %2773 = vmatpush3.bf16.msra.mxu1 %v2966_v34  ;;  %2734 = vmatprep.mubr.msk.bf16.mxu1 %vm3043_vm0, %v3042_v1  ;;  %v1118_v34 = vsel %vm1101_vm5, %v1109_v29, %v1117_v30  ;;  %v1126_v41 = vor.u32 %v1125_v37, %v1122_v36  ;;  %v1149_v3 = vrot.slane %v1147_v62, 1  ;;  %v934_v5 = vsel %vm746_vm4, %v931_v54, %v933_v0  ;;  %v3006_v37 = vld [vmem:[#allocation2 + $0x8] sm:$0xfc]   ;;  %v3011_v0 = vld [vmem:[#allocation2 + $0x20] sm:$0xff]  }
  0x2d   : > { %2816 = vmatprep.subr.bf16.mxu1 %v3042_v1  ;;  %v928_v39 = vsel %vm746_vm4, %v925_v19, %v927_v33  ;;  %v930_v49 = vsel %vm746_vm4, %v927_v33, %v929_v44  ;;  %v1500_v18 = vrot.slane %v2997_v13, 2  ;;  %v1325_v19 = vrot.slane %v2995_v16, 2  ;;  %v3013_v12 = vld [vmem:[#allocation2 + $0x28] sm:$0xff]  }
  0x2e   : > { %v1502_v25 = vrot.slane %v3000_v22, 2  ;;  %v1504_v31 = vrot.slane %v3002_v28, 2  ;;  %v1716_v16 = vshll.u32 %v3013_v12, 16  ;;  %v3015_v22 = vld [vmem:[#allocation2 + $0x30] ss:$0 sps:$4 sm:$0x77]  }
  0x2f   : > { %v1501_v20 = vsel %vm1321_vm6, %v1499_v17, %v1500_v18  ;;  %v1326_v23 = vsel %vm1321_vm6, %v1323_v10, %v1325_v19  ;;  %v3016_v28 = vld [vmem:[#allocation2 + $0x28] sm:$0xff]   ;;  %vm2332_vm3 = vcmask 257024  }
  0x30   : > { %v1505_v33 = vsel %vm1321_vm6, %v1502_v25, %v1504_v31 }
  0x31   : > { %2753 = vmatmul.mubr.msk.bf16.vlgmr.msra.gmra.mxu0 %vm393_vm2, %v749_v43  ;;  %v1132_v43 = vshll.u32 %v2988_v38, 16 }
  0x32   : > { %2795 = vmatpush3.bf16.msra.mxu0 %v2970_v42  ;;  %2756 = vmatprep.mubr.msk.bf16.mxu0 %vm3043_vm0, %v3042_v1  ;;  %v1129_v42 = vshrl.u32 %v2988_v38, 16  ;;  %v3007_v38 = vld [vmem:[#allocation2 + $0x10] sm:$0xff]  }
  0x33   : > { %2735 = vmatmul.mubr.msk.bf16.gmra.mxu1 %vm393_vm2, %v555_v45  ;;  %2838 = vmatprep.subr.bf16.mxu0 %v3042_v1  ;;  %v1127_v45 = vsel %vm1101_vm5, %v1117_v30, %v1126_v41  ;;  %v1134_v47 = vrot.slane %v1132_v43, 2  ;;  %v3001_v30 = vld [vmem:[#allocation2 + $0x24] sm:$0xff]   ;;  %v1686_v43 = vshrl.u32 %v3007_v38, 16  ;;  %v1689_v44 = vshll.u32 %v3007_v38, 16 }
  0x34   : > { %2738 = vmatprep.mubr.msk.bf16.mxu1 %vm3043_vm0, %v3042_v1  ;;  %v1131_v46 = vrot.slane %v1129_v42, 1  ;;  %v1329_v32 = vrot.slane %v3001_v30, 2  ;;  %v1681_v42 = vshll.u32 %v3006_v37, 16 }
  0x35   : > { %v1688_v50 = vrot.slane %v1686_v43, 2 }
  0x36   : > { %v1135_v51 = vor.u32 %v1134_v47, %v1131_v46  ;;  %v3005_v47 = vld [vmem:[#allocation2 + $0x30] ss:$0 sps:$4 sm:$0x33]  }
  0x37   : > { %v1508_v53 = vrot.slane %v3005_v47, 2 }
  0x38   : > { %v1136_v55 = vsel %vm1101_vm5, %v1126_v41, %v1135_v51  ;;  %v1678_v41 = vshrl.u32 %v3006_v37, 16 }
  0x39   : > { %2757 = vmatmul.mubr.msk.bf16.gmra.mxu0 %vm393_vm2, %v751_v52  ;;  %v1138_v52 = vshrl.u32 %v2990_v48, 16 }
  0x3a   : > { %2760 = vmatprep.mubr.msk.bf16.mxu0 %vm3043_vm0, %v3042_v1  ;;  %v1680_v48 = vrot.slane %v1678_v41, 2 }
  0x3b   : > { %2739 = vmatmul.mubr.msk.bf16.gmra.mxu1 %vm393_vm2, %v563_v56  ;;  %v1140_v56 = vrot.slane %v1138_v52, 1  ;;  %v3008_v52 = vld [vmem:[#allocation2 + $0x18] sm:$0xff]  }
  0x3c   : > { %2742 = vmatprep.mubr.msk.bf16.mxu1 %vm3043_vm0, %v3042_v1 }
  0x41   : > { %2761 = vmatmul.mubr.msk.bf16.gmra.mxu0 %vm393_vm2, %v753_v61  ;;  %v1144_v61 = vor.u32 %v1143_v57, %v1140_v56  ;;  %v1695_v56 = vshrl.u32 %v3008_v52, 16  ;;  %v1698_v57 = vshll.u32 %v3008_v52, 16 }
  0x42   : > { %2764 = vmatprep.mubr.msk.bf16.mxu0 %vm3043_vm0, %v3042_v1 }
  0x43   : > { %2743 = vmatmul.mubr.msk.bf16.gmra.mxu1 %vm393_vm2, %v571_v63  ;;  %v1150_v63 = vshll.u32 %v2991_v58, 16  ;;  %v1145_v2 = vsel %vm1101_vm5, %v1135_v51, %v1144_v61  ;;  %v1691_v51 = vrot.slane %v1689_v44, 3  ;;  %v1697_v62 = vrot.slane %v1695_v56, 2 }
  0x44   : > { %2746 = vmatprep.mubr.msk.bf16.mxu1 %vm3043_vm0, %v3042_v1 }
  0x45   : > { %v1152_v4 = vrot.slane %v1150_v63, 2  ;;  %v1700_v63 = vrot.slane %v1698_v57, 3 }
  0x47   : > { %v1153_v8 = vor.u32 %v1152_v4, %v1149_v3  ;;  %v1898_v3 = vrot.slane %v3010_v60, 3  ;;  %v1701_v4 = vor.u32 %v1700_v63, %v1697_v62 }
  0x49   : > { %2765 = vmatmul.mubr.msk.bf16.gmra.mxu0 %vm393_vm2, %v755_v9  ;;  %v1322_v9 = vrot.slane %v2992_v6, 2  ;;  %v1707_v6 = vshll.u32 %v3011_v0, 16 }
  0x4a   : > { %2768 = vmatprep.mubr.msk.bf16.mxu0 %vm3043_vm0, %v3042_v1 }
  0x4b   : > { %2747 = vmatmul.mubr.msk.bf16.gmra.mxu1 %vm393_vm2, %v579_v11  ;;  %v1154_v11 = vsel %vm1101_vm5, %v1144_v61, %v1153_v8  ;;  %v1324_v14 = vsel %vm1321_vm6, %v1322_v9, %v1323_v10  ;;  %v3012_v8 = vld [vmem:[#allocation2 + $0x18] sm:$0xff]  }
  0x4c   : > { %2774 = vmatprep.mubr.msk.bf16.mxu1 %vm3043_vm0, %v3042_v1  ;;  %v1900_v13 = vrot.slane %v3012_v8, 3 }
  0x4e   : > { %v1901_v17 = vsel %vm1896_vm8, %v1898_v3, %v1900_v13 }
  0x51   : > { %2769 = vmatmul.mubr.msk.bf16.gmra.mxu0 %vm393_vm2, %v757_v24  ;;  %v2999_v24 = vld [vmem:[#allocation2 + $0x1c] sm:$0xff]  }
  0x52   : > { %2796 = vmatprep.mubr.msk.bf16.mxu0 %vm3043_vm0, %v3042_v1  ;;  %v1327_v26 = vrot.slane %v2999_v24, 2 }
  0x53   : > { %2775 = vmatmul.mubr.msk.bf16.vlgmr.msra.gmra.mxu1 %vm393_vm2, %v926_v27  ;;  %v1503_v27 = vsel %vm1321_vm6, %v1500_v18, %v1502_v25  ;;  %v3014_v18 = vld [vmem:[#allocation2 + $0x20] sm:$0xff]   ;;  %v1722_v25 = vshrl.u32 %v3015_v22, 16 }
  0x54   : > { %2817 = vmatpush3.bf16.msra.mxu1 %v2980_v21  ;;  %2778 = vmatprep.mubr.msk.bf16.mxu1 %vm3043_vm0, %v3042_v1  ;;  %v2998_v21 = vld [vmem:[%s3703_s2 + $0x40] sm:$0xff]   ;;  %v1328_v29 = vsel %vm1321_vm6, %v1325_v19, %v1327_v26  ;;  %v1330_v36 = vsel %vm1321_vm6, %v1327_v26, %v1329_v32  ;;  %v1725_v26 = vshll.u32 %v3015_v22, 16 }
  0x55   : > { %2860 = vmatprep.subr.bf16.mxu1 %v3042_v1  ;;  %v1724_v30 = vrot.slane %v1722_v25, 2 }
  0x59   : > { %2797 = vmatmul.mubr.msk.bf16.vlgmr.msra.gmra.mxu0 %vm393_vm2, %v1118_v34  ;;  %v3003_v34 = vld [vmem:[#allocation2 + $0x2c] ss:$0 sps:$4 sm:$0x33]  }
  0x5a   : > { %2839 = vmatpush3.bf16.msra.mxu0 %v2984_v35  ;;  %2800 = vmatprep.mubr.msk.bf16.mxu0 %vm3043_vm0, %v3042_v1  ;;  %v3004_v35 = vld [vmem:[#allocation2 + $0x28] sm:$0xff]  }
  0x5b   : > { %2779 = vmatmul.mubr.msk.bf16.gmra.mxu1 %vm393_vm2, %v928_v39  ;;  %2882 = vmatprep.subr.bf16.mxu0 %v3042_v1  ;;  %v1331_v39 = vrot.slane %v3003_v34, 2  ;;  %v1506_v40 = vrot.slane %v3004_v35, 2  ;;  %v3017_v35 = vld [vmem:[#allocation2 + $0x30] ss:$0 sps:$4 sm:$0x77]  }
  0x5c   : > { %2782 = vmatprep.mubr.msk.bf16.mxu1 %vm3043_vm0, %v3042_v1  ;;  %v1906_v37 = vrot.slane %v3017_v35, 3 }
  0x5d   : > { %v1507_v46 = vsel %vm1321_vm6, %v1504_v31, %v1506_v40  ;;  %v1509_v58 = vsel %vm1321_vm6, %v1506_v40, %v1508_v53  ;;  %v1727_v31 = vrot.slane %v1725_v26, 3 }
  0x61   : > { %2801 = vmatmul.mubr.msk.bf16.gmra.mxu0 %vm393_vm2, %v1127_v45  ;;  %v1332_v45 = vsel %vm1321_vm6, %v1329_v32, %v1331_v39  ;;  %v1904_v32 = vrot.slane %v3016_v28, 3 }
  0x62   : > { %2804 = vmatprep.mubr.msk.bf16.mxu0 %vm3043_vm0, %v3042_v1 }
  0x63   : > { %2783 = vmatmul.mubr.msk.bf16.gmra.mxu1 %vm393_vm2, %v930_v49  ;;  %v1683_v49 = vrot.slane %v1681_v42, 3  ;;  %v1907_v38 = vsel %vm1896_vm8, %v1904_v32, %v1906_v37 }
  0x64   : > { %2786 = vmatprep.mubr.msk.bf16.mxu1 %vm3043_vm0, %v3042_v1 }
  0x65   : > { %v1684_v54 = vor.u32 %v1683_v49, %v1680_v48 }
  0x69   : > { %2805 = vmatmul.mubr.msk.bf16.gmra.mxu0 %vm393_vm2, %v1136_v55  ;;  %v1692_v55 = vor.u32 %v1691_v51, %v1688_v50 }
  0x6a   : > { %2808 = vmatprep.mubr.msk.bf16.mxu0 %vm3043_vm0, %v3042_v1 }
  0x6b   : > { %2787 = vmatmul.mubr.msk.bf16.gmra.mxu1 %vm393_vm2, %v932_v59  ;;  %v3009_v59 = vld [vmem:[#allocation2 + $0x8] sm:$0xf8]   ;;  %v1693_v61 = vsel %vm1676_vm7, %v1684_v54, %v1692_v55  ;;  %v1702_v9 = vsel %vm1676_vm7, %v1692_v55, %v1701_v4 }
  0x6c   : > { %2790 = vmatprep.mubr.msk.bf16.mxu1 %vm3043_vm0, %v3042_v1 }
  0x71   : > { %2809 = vmatmul.mubr.msk.bf16.gmra.mxu0 %vm393_vm2, %v1145_v2  ;;  %v1897_v2 = vrot.slane %v3009_v59, 3 }
  0x72   : > { %2812 = vmatprep.mubr.msk.bf16.mxu0 %vm3043_vm0, %v3042_v1 }
  0x73   : > { %2791 = vmatmul.mubr.msk.bf16.gmra.mxu1 %vm393_vm2, %v934_v5  ;;  %v1704_v5 = vshrl.u32 %v3011_v0, 16  ;;  %v1899_v7 = vsel %vm1896_vm8, %v1897_v2, %v1898_v3 }
  0x74   : > { %2818 = vmatprep.mubr.msk.bf16.mxu1 %vm3043_vm0, %v3042_v1 }
  0x75   : > { %v1706_v10 = vrot.slane %v1704_v5, 2 }
  0x79   : > { %2813 = vmatmul.mubr.msk.bf16.gmra.mxu0 %vm393_vm2, %v1154_v11  ;;  %v1709_v11 = vrot.slane %v1707_v6, 3 }
  0x7a   : > { %2840 = vmatprep.mubr.msk.bf16.mxu0 %vm3043_vm0, %v3042_v1 }
  0x7b   : > { %2819 = vmatmul.mubr.msk.bf16.vlgmr.msra.gmra.mxu1 %vm393_vm2, %v1324_v14  ;;  %v1710_v14 = vor.u32 %v1709_v11, %v1706_v10 }
  0x7c   : > { %2861 = vmatpush3.bf16.msra.mxu1 %v2994_v15  ;;  %2822 = vmatprep.mubr.msk.bf16.mxu1 %vm3043_vm0, %v3042_v1  ;;  %v1713_v15 = vshrl.u32 %v3013_v12, 16 }
  0x7d   : > { %v1711_v19 = vsel %vm1676_vm7, %v1701_v4, %v1710_v14 }
  0x81   : > { %2841 = vmatmul.mubr.msk.bf16.vlgmr.msra.gmra.mxu0 %vm393_vm2, %v1501_v20  ;;  %v1715_v20 = vrot.slane %v1713_v15, 2 }
  0x82   : > { %2883 = vmatpush3.bf16.msra.mxu0 %v2998_v21  ;;  %2844 = vmatprep.mubr.msk.bf16.mxu0 %vm3043_vm0, %v3042_v1  ;;  %v1718_v21 = vrot.slane %v1716_v16, 3 }
  0x83   : > { %2823 = vmatmul.mubr.msk.bf16.gmra.mxu1 %vm393_vm2, %v1326_v23  ;;  %v1902_v23 = vrot.slane %v3014_v18, 3 }
  0x84   : > { %2826 = vmatprep.mubr.msk.bf16.mxu1 %vm3043_vm0, %v3042_v1  ;;  %v1719_v24 = vor.u32 %v1718_v21, %v1715_v20 }
  0x85   : > { %v1905_v34 = vsel %vm1896_vm8, %v1902_v23, %v1904_v32 }
  0x89   : > { %2845 = vmatmul.mubr.msk.bf16.gmra.mxu0 %vm393_vm2, %v1503_v27  ;;  %v1903_v27 = vsel %vm1896_vm8, %v1900_v13, %v1902_v23 }
  0x8a   : > { %2848 = vmatprep.mubr.msk.bf16.mxu0 %vm3043_vm0, %v3042_v1 }
  0x8b   : > { %2827 = vmatmul.mubr.msk.bf16.gmra.mxu1 %vm393_vm2, %v1328_v29  ;;  %v1720_v29 = vsel %vm1676_vm7, %v1710_v14, %v1719_v24 }
  0x8c   : > { %2830 = vmatprep.mubr.msk.bf16.mxu1 %vm3043_vm0, %v3042_v1 }
  0x91   : > { %2849 = vmatmul.mubr.msk.bf16.gmra.mxu0 %vm393_vm2, %v1505_v33  ;;  %v1728_v33 = vor.u32 %v1727_v31, %v1724_v30 }
  0x92   : > { %2852 = vmatprep.mubr.msk.bf16.mxu0 %vm3043_vm0, %v3042_v1 }
  0x93   : > { %2831 = vmatmul.mubr.msk.bf16.gmra.mxu1 %vm393_vm2, %v1330_v36  ;;  %v1729_v36 = vsel %vm1676_vm7, %v1719_v24, %v1728_v33 }
  0x94   : > { %2834 = vmatprep.mubr.msk.bf16.mxu1 %vm3043_vm0, %v3042_v1 }
  0x99   : > { %2853 = vmatmul.mubr.msk.bf16.gmra.mxu0 %vm393_vm2, %v1507_v46 }
  0x9a   : > { %2856 = vmatprep.mubr.msk.bf16.mxu0 %vm3043_vm0, %v3042_v1 }
  0x9b   : > { %2835 = vmatmul.mubr.msk.bf16.gmra.mxu1 %vm393_vm2, %v1332_v45 }
  0x9c   : > { %2862 = vmatprep.mubr.msk.bf16.mxu1 %vm3043_vm0, %v3042_v1 }
  0xa1   : > { %2857 = vmatmul.mubr.msk.bf16.gmra.mxu0 %vm393_vm2, %v1509_v58 }
  0xa2   : > { %2884 = vmatprep.mubr.msk.bf16.mxu0 %vm3043_vm0, %v3042_v1 }
  0xa3   : > { %2863 = vmatmul.mubr.msk.bf16.vlgmr.msra.gmra.mxu1 %vm393_vm2, %v1693_v61 }
  0xa4   : > { %2866 = vmatprep.mubr.msk.bf16.mxu1 %vm3043_vm0, %v3042_v1 }
  0xa9   : > { %2885 = vmatmul.mubr.msk.bf16.vlgmr.msra.gmra.mxu0 %vm393_vm2, %v1899_v7 }
  0xaa   : > { %2888 = vmatprep.mubr.msk.bf16.mxu0 %vm3043_vm0, %v3042_v1 }
  0xab   : > { %2867 = vmatmul.mubr.msk.bf16.gmra.mxu1 %vm393_vm2, %v1702_v9 }
  0xac   : > { %2870 = vmatprep.mubr.msk.bf16.mxu1 %vm3043_vm0, %v3042_v1 }
  0xb1   : > { %2889 = vmatmul.mubr.msk.bf16.gmra.mxu0 %vm393_vm2, %v1901_v17 }
  0xb2   : > { %2892 = vmatprep.mubr.msk.bf16.mxu0 %vm3043_vm0, %v3042_v1 }
  0xb3   : > { %2871 = vmatmul.mubr.msk.bf16.gmra.mxu1 %vm393_vm2, %v1711_v19 }
  0xb4   : > { %2874 = vmatprep.mubr.msk.bf16.mxu1 %vm3043_vm0, %v3042_v1 }
  0xb9   : > { %2893 = vmatmul.mubr.msk.bf16.gmra.mxu0 %vm393_vm2, %v1903_v27 }
  0xba   : > { %2896 = vmatprep.mubr.msk.bf16.mxu0 %vm3043_vm0, %v3042_v1 }
  0xbb   : > { %2875 = vmatmul.mubr.msk.bf16.gmra.mxu1 %vm393_vm2, %v1720_v29 }
  0xbc   : > { %2878 = vmatprep.mubr.msk.bf16.mxu1 %vm3043_vm0, %v3042_v1 }
  0xc1   : > { %2897 = vmatmul.mubr.msk.bf16.gmra.mxu0 %vm393_vm2, %v1905_v34 }
  0xc2   : > { %2900 = vmatprep.mubr.msk.bf16.mxu0 %vm3043_vm0, %v3042_v1 }
  0xc3   : > { %2879 = vmatmul.mubr.msk.bf16.gmra.mxu1 %vm393_vm2, %v1729_v36 }
  0xc9   : > { %2901 = vmatmul.mubr.msk.bf16.gmra.mxu0 %vm393_vm2, %v1907_v38 }
  0xd9   : > { %v443_v39 = vpop.f32.mrf.mxu0 }
  0xda   : > { %483 = vst.msk [vmem:[#allocation3] sm:$0xff] %vm482_vm9, %v443_v39 }
  0xdb   : > { %v467_v40 = vpop.f32.mrf.mxu1  ;;  %v2710_v41 = vpop.f32.mrf.mxu0 }
  0xdc   : > { %489 = vst.msk [vmem:[#allocation3 + $0x30] sm:$0xff] %vm482_vm9, %v467_v40 }
  0xdd   : > { %v2722_v42 = vpop.f32.mrf.mxu1  ;;  %v446_v43 = vpop.f32.mrf.mxu0 }
  0xde   : > { %484 = vst.msk [vmem:[#allocation3 + $0x8] sm:$0xff] %vm482_vm9, %v446_v43 }
  0xdf   : > { %v470_v44 = vpop.f32.mrf.mxu1  ;;  %v2711_v1 = vpop.f32.mrf.mxu0 }
  0xe0   : > { %490 = vst.msk [vmem:[#allocation3 + $0x38] sm:$0xff] %vm482_vm9, %v470_v44 }
  0xe1   : > { %v2723_v45 = vpop.f32.mrf.mxu1  ;;  %v451_v46 = vpop.f32.mrf.mxu0  ;;  %v674_v56 = vld [vmem:[#allocation3] sm:$0xff] }
  0xe2   : > { %485 = vst.msk [vmem:[#allocation3 + $0x10] sm:$0xff] %vm482_vm9, %v451_v46 }
  0xe3   : > { %v475_v47 = vpop.f32.mrf.mxu1  ;;  %v2714_v48 = vpop.f32.mrf.mxu0  ;;  %v680_v37 = vld [vmem:[#allocation3 + $0x30] sm:$0xff] }
  0xe4   : > { %491 = vst.msk [vmem:[#allocation3 + $0x40] sm:$0xff] %vm482_vm9, %v475_v47 }
  0xe5   : > { %v2726_v49 = vpop.f32.mrf.mxu1  ;;  %v454_v50 = vpop.f32.mrf.mxu0  ;;  %v675_v62 = vld [vmem:[#allocation3 + $0x8] sm:$0xff] }
  0xe6   : > { %486 = vst.msk [vmem:[#allocation3 + $0x18] sm:$0xff] %vm482_vm9, %v454_v50 }
  0xe7   : > { %v478_v51 = vpop.f32.mrf.mxu1  ;;  %v2715_v52 = vpop.f32.mrf.mxu0  ;;  %v681_v1 = vld [vmem:[#allocation3 + $0x38] sm:$0xff] }
  0xe8   : > { %492 = vst.msk [vmem:[#allocation3 + $0x48] sm:$0xff] %vm482_vm9, %v478_v51 }
  0xe9   : > { %v2727_v53 = vpop.f32.mrf.mxu1  ;;  %v459_v54 = vpop.f32.mrf.mxu0  ;;  %v676_v5 = vld [vmem:[#allocation3 + $0x10] sm:$0xff] }
  0xea   : > { %487 = vst.msk [vmem:[#allocation3 + $0x20] sm:$0xff] %vm482_vm9, %v459_v54 }
  0xeb   : > { %v635_v55 = vpop.f32.mrf.mxu1  ;;  %v2718_v58 = vpop.f32.mrf.mxu0  ;;  %v682_v52 = vld [vmem:[#allocation3 + $0x40] sm:$0xff] }
  0xec   : > { %v684_v57 = vadd.f32 %v674_v56, %v635_v55 }
  0xed   : > { %v2732_v59 = vpop.f32.mrf.mxu1  ;;  %v462_v60 = vpop.f32.mrf.mxu0  ;;  %v677_v13 = vld [vmem:[#allocation3 + $0x18] sm:$0xff] }
  0xee   : > { %694 = vst.msk [vmem:[#allocation3] sm:$0xff] %vm482_vm9, %v684_v57  ;;  %488 = vst.msk [vmem:[#allocation3 + $0x28] sm:$0xff] %vm482_vm9, %v462_v60 }
  0xef   : > { %v638_v61 = vpop.f32.mrf.mxu1  ;;  %v2719_v0 = vpop.f32.mrf.mxu0  ;;  %v683_v60 = vld [vmem:[#allocation3 + $0x48] sm:$0xff] }
  0xf0   : > { %v685_v63 = vadd.f32 %v675_v62, %v638_v61 }
  0xf1   : > { %v2733_v2 = vpop.f32.mrf.mxu1  ;;  %v813_v3 = vpop.f32.mrf.mxu0  ;;  %v678_v21 = vld [vmem:[#allocation3 + $0x20] sm:$0xff] }
  0xf2   : > { %695 = vst.msk [vmem:[#allocation3 + $0x8] sm:$0xff] %vm482_vm9, %v685_v63 }
  0xf3   : > { %v643_v4 = vpop.f32.mrf.mxu1  ;;  %v2754_v7 = vpop.f32.mrf.mxu0 }
  0xf4   : > { %v686_v6 = vadd.f32 %v676_v5, %v643_v4 }
  0xf5   : > { %v852_v8 = vld [vmem:[#allocation3] sm:$0xff]  ;;  %v2736_v9 = vpop.f32.mrf.mxu1  ;;  %v816_v11 = vpop.f32.mrf.mxu0  ;;  %v679_v29 = vld [vmem:[#allocation3 + $0x28] sm:$0xff] }
  0xf6   : > { %696 = vst.msk [vmem:[#allocation3 + $0x10] sm:$0xff] %vm482_vm9, %v686_v6  ;;  %v862_v10 = vadd.f32 %v852_v8, %v813_v3 }
  0xf7   : > { %v646_v12 = vpop.f32.mrf.mxu1  ;;  %v2755_v15 = vpop.f32.mrf.mxu0 }
  0xf8   : > { %872 = vst.msk [vmem:[#allocation3] sm:$0xff] %vm482_vm9, %v862_v10  ;;  %v687_v14 = vadd.f32 %v677_v13, %v646_v12 }
  0xf9   : > { %v853_v16 = vld [vmem:[#allocation3 + $0x8] sm:$0xff]  ;;  %v2737_v17 = vpop.f32.mrf.mxu1  ;;  %v821_v19 = vpop.f32.mrf.mxu0 }
  0xfa   : > { %697 = vst.msk [vmem:[#allocation3 + $0x18] sm:$0xff] %vm482_vm9, %v687_v14  ;;  %v863_v18 = vadd.f32 %v853_v16, %v816_v11 }
  0xfb   : > { %v651_v20 = vpop.f32.mrf.mxu1  ;;  %v2758_v23 = vpop.f32.mrf.mxu0 }
  0xfc   : > { %873 = vst.msk [vmem:[#allocation3 + $0x8] sm:$0xff] %vm482_vm9, %v863_v18  ;;  %v688_v22 = vadd.f32 %v678_v21, %v651_v20 }
  0xfd   : > { %v854_v24 = vld [vmem:[#allocation3 + $0x10] sm:$0xff]  ;;  %v2740_v25 = vpop.f32.mrf.mxu1  ;;  %v824_v27 = vpop.f32.mrf.mxu0 }
  0xfe   : > { %698 = vst.msk [vmem:[#allocation3 + $0x20] sm:$0xff] %vm482_vm9, %v688_v22  ;;  %v864_v26 = vadd.f32 %v854_v24, %v821_v19 }
  0xff   : > { %v654_v28 = vpop.f32.mrf.mxu1  ;;  %v2759_v31 = vpop.f32.mrf.mxu0  ;;  %v1029_v5 = vld [vmem:[#allocation3] sm:$0xff] }
 0x100   : > { %874 = vst.msk [vmem:[#allocation3 + $0x10] sm:$0xff] %vm482_vm9, %v864_v26  ;;  %v689_v30 = vadd.f32 %v679_v29, %v654_v28 }
 0x101   : > { %v855_v32 = vld [vmem:[#allocation3 + $0x18] sm:$0xff]  ;;  %v2741_v33 = vpop.f32.mrf.mxu1  ;;  %v829_v35 = vpop.f32.mrf.mxu0 }
 0x102   : > { %699 = vst.msk [vmem:[#allocation3 + $0x28] sm:$0xff] %vm482_vm9, %v689_v30  ;;  %v865_v34 = vadd.f32 %v855_v32, %v824_v27 }
 0x103   : > { %v659_v36 = vpop.f32.mrf.mxu1  ;;  %v2762_v39 = vpop.f32.mrf.mxu0  ;;  %v1030_v13 = vld [vmem:[#allocation3 + $0x8] sm:$0xff] }
 0x104   : > { %875 = vst.msk [vmem:[#allocation3 + $0x18] sm:$0xff] %vm482_vm9, %v865_v34  ;;  %v690_v38 = vadd.f32 %v680_v37, %v659_v36 }
 0x105   : > { %v856_v40 = vld [vmem:[#allocation3 + $0x20] sm:$0xff]  ;;  %v2744_v41 = vpop.f32.mrf.mxu1  ;;  %v832_v43 = vpop.f32.mrf.mxu0 }
 0x106   : > { %700 = vst.msk [vmem:[#allocation3 + $0x30] sm:$0xff] %vm482_vm9, %v690_v38  ;;  %v866_v42 = vadd.f32 %v856_v40, %v829_v35 }
 0x107   : > { %v662_v44 = vpop.f32.mrf.mxu1  ;;  %v2763_v46 = vpop.f32.mrf.mxu0  ;;  %v1031_v21 = vld [vmem:[#allocation3 + $0x10] sm:$0xff] }
 0x108   : > { %876 = vst.msk [vmem:[#allocation3 + $0x20] sm:$0xff] %vm482_vm9, %v866_v42  ;;  %v691_v45 = vadd.f32 %v681_v1, %v662_v44 }
 0x109   : > { %v857_v47 = vld [vmem:[#allocation3 + $0x28] sm:$0xff]  ;;  %v2745_v48 = vpop.f32.mrf.mxu1  ;;  %v837_v50 = vpop.f32.mrf.mxu0 }
 0x10a   : > { %701 = vst.msk [vmem:[#allocation3 + $0x38] sm:$0xff] %vm482_vm9, %v691_v45  ;;  %v867_v49 = vadd.f32 %v857_v47, %v832_v43 }
 0x10b   : > { %v667_v51 = vpop.f32.mrf.mxu1  ;;  %v2766_v54 = vpop.f32.mrf.mxu0  ;;  %v1032_v29 = vld [vmem:[#allocation3 + $0x18] sm:$0xff] }
 0x10c   : > { %877 = vst.msk [vmem:[#allocation3 + $0x28] sm:$0xff] %vm482_vm9, %v867_v49  ;;  %v692_v53 = vadd.f32 %v682_v52, %v667_v51 }
 0x10d   : > { %v858_v55 = vld [vmem:[#allocation3 + $0x30] sm:$0xff]  ;;  %v2748_v56 = vpop.f32.mrf.mxu1  ;;  %v840_v58 = vpop.f32.mrf.mxu0 }
 0x10e   : > { %702 = vst.msk [vmem:[#allocation3 + $0x40] sm:$0xff] %vm482_vm9, %v692_v53  ;;  %v868_v57 = vadd.f32 %v858_v55, %v837_v50 }
 0x10f   : > { %v670_v59 = vpop.f32.mrf.mxu1  ;;  %v2767_v62 = vpop.f32.mrf.mxu0  ;;  %v1033_v37 = vld [vmem:[#allocation3 + $0x20] sm:$0xff] }
 0x110   : > { %878 = vst.msk [vmem:[#allocation3 + $0x30] sm:$0xff] %vm482_vm9, %v868_v57  ;;  %v693_v61 = vadd.f32 %v683_v60, %v670_v59 }
 0x111   : > { %v859_v63 = vld [vmem:[#allocation3 + $0x38] sm:$0xff]  ;;  %v2749_v0 = vpop.f32.mrf.mxu1  ;;  %v845_v3 = vpop.f32.mrf.mxu0 }
 0x112   : > { %703 = vst.msk [vmem:[#allocation3 + $0x48] sm:$0xff] %vm482_vm9, %v693_v61  ;;  %v869_v2 = vadd.f32 %v859_v63, %v840_v58 }
 0x113   : > { %v990_v4 = vpop.f32.mrf.mxu1  ;;  %v2770_v7 = vpop.f32.mrf.mxu0  ;;  %v1034_v1 = vld [vmem:[#allocation3 + $0x28] sm:$0xff] }
 0x114   : > { %879 = vst.msk [vmem:[#allocation3 + $0x38] sm:$0xff] %vm482_vm9, %v869_v2  ;;  %v1039_v6 = vadd.f32 %v1029_v5, %v990_v4 }
 0x115   : > { %v860_v8 = vld [vmem:[#allocation3 + $0x40] sm:$0xff]  ;;  %v2776_v9 = vpop.f32.mrf.mxu1  ;;  %v848_v11 = vpop.f32.mrf.mxu0 }
 0x116   : > { %v870_v10 = vadd.f32 %v860_v8, %v845_v3  ;;  %1049 = vst.msk [vmem:[#allocation3] sm:$0xff] %vm482_vm9, %v1039_v6 }
 0x117   : > { %v993_v12 = vpop.f32.mrf.mxu1  ;;  %v2771_v15 = vpop.f32.mrf.mxu0  ;;  %v1035_v52 = vld [vmem:[#allocation3 + $0x30] sm:$0xff] }
 0x118   : > { %880 = vst.msk [vmem:[#allocation3 + $0x40] sm:$0xff] %vm482_vm9, %v870_v10  ;;  %v1040_v14 = vadd.f32 %v1030_v13, %v993_v12 }
 0x119   : > { %v861_v16 = vld [vmem:[#allocation3 + $0x48] sm:$0xff]  ;;  %v2777_v17 = vpop.f32.mrf.mxu1  ;;  %v1210_v19 = vpop.f32.mrf.mxu0 }
 0x11a   : > { %v871_v18 = vadd.f32 %v861_v16, %v848_v11  ;;  %1050 = vst.msk [vmem:[#allocation3 + $0x8] sm:$0xff] %vm482_vm9, %v1040_v14 }
 0x11b   : > { %v998_v20 = vpop.f32.mrf.mxu1  ;;  %v2798_v23 = vpop.f32.mrf.mxu0  ;;  %v1036_v60 = vld [vmem:[#allocation3 + $0x38] sm:$0xff] }
 0x11c   : > { %881 = vst.msk [vmem:[#allocation3 + $0x48] sm:$0xff] %vm482_vm9, %v871_v18  ;;  %v1041_v22 = vadd.f32 %v1031_v21, %v998_v20 }
 0x11d   : > { %v1249_v24 = vld [vmem:[#allocation3] sm:$0xff]  ;;  %v2780_v25 = vpop.f32.mrf.mxu1  ;;  %v1213_v27 = vpop.f32.mrf.mxu0 }
 0x11e   : > { %1051 = vst.msk [vmem:[#allocation3 + $0x10] sm:$0xff] %vm482_vm9, %v1041_v22  ;;  %v1259_v26 = vadd.f32 %v1249_v24, %v1210_v19 }
 0x11f   : > { %v1001_v28 = vpop.f32.mrf.mxu1  ;;  %v2799_v31 = vpop.f32.mrf.mxu0  ;;  %v1037_v5 = vld [vmem:[#allocation3 + $0x40] sm:$0xff] }
 0x120   : > { %1269 = vst.msk [vmem:[#allocation3] sm:$0xff] %vm482_vm9, %v1259_v26  ;;  %v1042_v30 = vadd.f32 %v1032_v29, %v1001_v28 }
 0x121   : > { %v1250_v32 = vld [vmem:[#allocation3 + $0x8] sm:$0xff]  ;;  %v2781_v33 = vpop.f32.mrf.mxu1  ;;  %v1218_v35 = vpop.f32.mrf.mxu0 }
 0x122   : > { %1052 = vst.msk [vmem:[#allocation3 + $0x18] sm:$0xff] %vm482_vm9, %v1042_v30  ;;  %v1260_v34 = vadd.f32 %v1250_v32, %v1213_v27 }
 0x123   : > { %v1006_v36 = vpop.f32.mrf.mxu1  ;;  %v2802_v39 = vpop.f32.mrf.mxu0  ;;  %v1038_v13 = vld [vmem:[#allocation3 + $0x48] sm:$0xff] }
 0x124   : > { %1270 = vst.msk [vmem:[#allocation3 + $0x8] sm:$0xff] %vm482_vm9, %v1260_v34  ;;  %v1043_v38 = vadd.f32 %v1033_v37, %v1006_v36 }
 0x125   : > { %v1251_v40 = vld [vmem:[#allocation3 + $0x10] sm:$0xff]  ;;  %v2784_v41 = vpop.f32.mrf.mxu1  ;;  %v1221_v43 = vpop.f32.mrf.mxu0 }
 0x126   : > { %1053 = vst.msk [vmem:[#allocation3 + $0x20] sm:$0xff] %vm482_vm9, %v1043_v38  ;;  %v1261_v42 = vadd.f32 %v1251_v40, %v1218_v35 }
 0x127   : > { %v1009_v44 = vpop.f32.mrf.mxu1  ;;  %v2803_v46 = vpop.f32.mrf.mxu0  ;;  %v1427_v21 = vld [vmem:[#allocation3] sm:$0xff] }
 0x128   : > { %1271 = vst.msk [vmem:[#allocation3 + $0x10] sm:$0xff] %vm482_vm9, %v1261_v42  ;;  %v1044_v45 = vadd.f32 %v1034_v1, %v1009_v44 }
 0x129   : > { %v1252_v47 = vld [vmem:[#allocation3 + $0x18] sm:$0xff]  ;;  %v2785_v48 = vpop.f32.mrf.mxu1  ;;  %v1226_v50 = vpop.f32.mrf.mxu0 }
 0x12a   : > { %1054 = vst.msk [vmem:[#allocation3 + $0x28] sm:$0xff] %vm482_vm9, %v1044_v45  ;;  %v1262_v49 = vadd.f32 %v1252_v47, %v1221_v43 }
 0x12b   : > { %v1014_v51 = vpop.f32.mrf.mxu1  ;;  %v2806_v54 = vpop.f32.mrf.mxu0  ;;  %v1428_v29 = vld [vmem:[#allocation3 + $0x8] sm:$0xff] }
 0x12c   : > { %1272 = vst.msk [vmem:[#allocation3 + $0x18] sm:$0xff] %vm482_vm9, %v1262_v49  ;;  %v1045_v53 = vadd.f32 %v1035_v52, %v1014_v51 }
 0x12d   : > { %v1253_v55 = vld [vmem:[#allocation3 + $0x20] sm:$0xff]  ;;  %v2788_v56 = vpop.f32.mrf.mxu1  ;;  %v1229_v58 = vpop.f32.mrf.mxu0 }
 0x12e   : > { %1055 = vst.msk [vmem:[#allocation3 + $0x30] sm:$0xff] %vm482_vm9, %v1045_v53  ;;  %v1263_v57 = vadd.f32 %v1253_v55, %v1226_v50 }
 0x12f   : > { %v1017_v59 = vpop.f32.mrf.mxu1  ;;  %v2807_v62 = vpop.f32.mrf.mxu0  ;;  %v1429_v37 = vld [vmem:[#allocation3 + $0x10] sm:$0xff] }
 0x130   : > { %1273 = vst.msk [vmem:[#allocation3 + $0x20] sm:$0xff] %vm482_vm9, %v1263_v57  ;;  %v1046_v61 = vadd.f32 %v1036_v60, %v1017_v59 }
 0x131   : > { %v1254_v63 = vld [vmem:[#allocation3 + $0x28] sm:$0xff]  ;;  %v2789_v0 = vpop.f32.mrf.mxu1  ;;  %v1234_v3 = vpop.f32.mrf.mxu0 }
 0x132   : > { %1056 = vst.msk [vmem:[#allocation3 + $0x38] sm:$0xff] %vm482_vm9, %v1046_v61  ;;  %v1264_v2 = vadd.f32 %v1254_v63, %v1229_v58 }
 0x133   : > { %v1022_v4 = vpop.f32.mrf.mxu1  ;;  %v2810_v7 = vpop.f32.mrf.mxu0  ;;  %v1430_v1 = vld [vmem:[#allocation3 + $0x18] sm:$0xff] }
 0x134   : > { %1274 = vst.msk [vmem:[#allocation3 + $0x28] sm:$0xff] %vm482_vm9, %v1264_v2  ;;  %v1047_v6 = vadd.f32 %v1037_v5, %v1022_v4 }
 0x135   : > { %v1255_v8 = vld [vmem:[#allocation3 + $0x30] sm:$0xff]  ;;  %v2792_v9 = vpop.f32.mrf.mxu1  ;;  %v1237_v11 = vpop.f32.mrf.mxu0 }
 0x136   : > { %1057 = vst.msk [vmem:[#allocation3 + $0x40] sm:$0xff] %vm482_vm9, %v1047_v6  ;;  %v1265_v10 = vadd.f32 %v1255_v8, %v1234_v3  ;;  %v2069_v6 = vlaneseq }
 0x137   : > { %v1025_v12 = vpop.f32.mrf.mxu1  ;;  %v2811_v15 = vpop.f32.mrf.mxu0  ;;  %v1431_v52 = vld [vmem:[#allocation3 + $0x20] sm:$0xff] }
 0x138   : > { %1275 = vst.msk [vmem:[#allocation3 + $0x30] sm:$0xff] %vm482_vm9, %v1265_v10  ;;  %v1048_v14 = vadd.f32 %v1038_v13, %v1025_v12  ;;  %v3382_v15 = vshrl.u32 %v2069_v6, 7 }
 0x139   : > { %v1256_v16 = vld [vmem:[#allocation3 + $0x38] sm:$0xff]  ;;  %v2793_v17 = vpop.f32.mrf.mxu1  ;;  %v1242_v19 = vpop.f32.mrf.mxu0 }
 0x13a   : > { %1058 = vst.msk [vmem:[#allocation3 + $0x48] sm:$0xff] %vm482_vm9, %v1048_v14  ;;  %v1266_v18 = vadd.f32 %v1256_v16, %v1237_v11 }
 0x13b   : > { %v1388_v20 = vpop.f32.mrf.mxu1  ;;  %v2814_v23 = vpop.f32.mrf.mxu0  ;;  %v1432_v60 = vld [vmem:[#allocation3 + $0x28] sm:$0xff] }
 0x13c   : > { %1276 = vst.msk [vmem:[#allocation3 + $0x38] sm:$0xff] %vm482_vm9, %v1266_v18  ;;  %v1437_v22 = vadd.f32 %v1427_v21, %v1388_v20  ;;  %v3386_v20 = vadd.s32 8, %v3382_v15 }
 0x13d   : > { %v1257_v24 = vld [vmem:[#allocation3 + $0x40] sm:$0xff]  ;;  %v2820_v25 = vpop.f32.mrf.mxu1  ;;  %v1245_v27 = vpop.f32.mrf.mxu0 }
 0x13e   : > { %v1267_v26 = vadd.f32 %v1257_v24, %v1242_v19  ;;  %1447 = vst.msk [vmem:[#allocation3] sm:$0xff] %vm482_vm9, %v1437_v22 }
 0x13f   : > { %v1391_v28 = vpop.f32.mrf.mxu1  ;;  %v2815_v31 = vpop.f32.mrf.mxu0  ;;  %v1433_v5 = vld [vmem:[#allocation3 + $0x30] sm:$0xff] }
 0x140   : > { %1277 = vst.msk [vmem:[#allocation3 + $0x40] sm:$0xff] %vm482_vm9, %v1267_v26  ;;  %v1438_v30 = vadd.f32 %v1428_v29, %v1391_v28  ;;  %v3390_v25 = vmul.u32.u64.low 3435973837, %v3382_v15  ;;  %v3391_v26 = vmul.u32.u64.high 3435973837, %v3382_v15, %v3390_v25 }
 0x141   : > { %v1258_v32 = vld [vmem:[#allocation3 + $0x48] sm:$0xff]  ;;  %v2821_v33 = vpop.f32.mrf.mxu1  ;;  %v1565_v35 = vpop.f32.mrf.mxu0 }
 0x142   : > { %v1268_v34 = vadd.f32 %v1258_v32, %v1245_v27  ;;  %1448 = vst.msk [vmem:[#allocation3 + $0x8] sm:$0xff] %vm482_vm9, %v1438_v30  ;;  %v3395_v31 = vmul.u32.u64.low 3435973837, %v3386_v20  ;;  %v3396_v32 = vmul.u32.u64.high 3435973837, %v3386_v20, %v3395_v31  ;;  %v3399_v33 = vadd.s32 16, %v3382_v15 }
 0x143   : > { %v1396_v36 = vpop.f32.mrf.mxu1  ;;  %v2842_v39 = vpop.f32.mrf.mxu0  ;;  %v1434_v14 = vld [vmem:[#allocation3 + $0x38] sm:$0xff] }
 0x144   : > { %1278 = vst.msk [vmem:[#allocation3 + $0x48] sm:$0xff] %vm482_vm9, %v1268_v34  ;;  %v1439_v38 = vadd.f32 %v1429_v37, %v1396_v36 }
 0x145   : > { %v1604_v40 = vld [vmem:[#allocation3] sm:$0xff]  ;;  %v2824_v41 = vpop.f32.mrf.mxu1  ;;  %v1568_v43 = vpop.f32.mrf.mxu0 }
 0x146   : > { %1449 = vst.msk [vmem:[#allocation3 + $0x10] sm:$0xff] %vm482_vm9, %v1439_v38  ;;  %v1614_v42 = vadd.f32 %v1604_v40, %v1565_v35 }
 0x147   : > { %v1399_v44 = vpop.f32.mrf.mxu1  ;;  %v2843_v46 = vpop.f32.mrf.mxu0  ;;  %v1435_v24 = vld [vmem:[#allocation3 + $0x40] sm:$0xff] }
 0x148   : > { %1624 = vst.msk [vmem:[#allocation3] sm:$0xff] %vm482_vm9, %v1614_v42  ;;  %v1440_v45 = vadd.f32 %v1430_v1, %v1399_v44  ;;  %v3408_v44 = vadd.s32 24, %v3382_v15 }
 0x149   : > { %v1605_v47 = vld [vmem:[#allocation3 + $0x8] sm:$0xff]  ;;  %v2825_v48 = vpop.f32.mrf.mxu1  ;;  %v1573_v50 = vpop.f32.mrf.mxu0 }
 0x14a   : > { %1450 = vst.msk [vmem:[#allocation3 + $0x18] sm:$0xff] %vm482_vm9, %v1440_v45  ;;  %v1615_v49 = vadd.f32 %v1605_v47, %v1568_v43  ;;  %v3404_v42 = vmul.u32.u64.low 3435973837, %v3399_v33  ;;  %v3405_v43 = vmul.u32.u64.high 3435973837, %v3399_v33, %v3404_v42  ;;  %v2098_v48 = vshrl.u32 %v3391_v26, 3 }
 0x14b   : > { %v1404_v51 = vpop.f32.mrf.mxu1  ;;  %v2846_v54 = vpop.f32.mrf.mxu0  ;;  %v1436_v37 = vld [vmem:[#allocation3 + $0x48] sm:$0xff] }
 0x14c   : > { %1625 = vst.msk [vmem:[#allocation3 + $0x8] sm:$0xff] %vm482_vm9, %v1615_v49  ;;  %v1441_v53 = vadd.f32 %v1431_v52, %v1404_v51 }
 0x14d   : > { %v1606_v55 = vld [vmem:[#allocation3 + $0x10] sm:$0xff]  ;;  %v2828_v56 = vpop.f32.mrf.mxu1  ;;  %v1576_v58 = vpop.f32.mrf.mxu0 }
 0x14e   : > { %1451 = vst.msk [vmem:[#allocation3 + $0x20] sm:$0xff] %vm482_vm9, %v1441_v53  ;;  %v1616_v57 = vadd.f32 %v1606_v55, %v1573_v50  ;;  %v2109_v53 = vshrl.u32 %v3396_v32, 3  ;;  %v3415_v54 = vmul.u32.u64.low 3435973837, %v3408_v44  ;;  %v3416_v55 = vmul.u32.u64.high 3435973837, %v3408_v44, %v3415_v54 }
 0x14f   : > { %v1407_v59 = vpop.f32.mrf.mxu1  ;;  %v2847_v62 = vpop.f32.mrf.mxu0  ;;  %v1824_v47 = vld [vmem:[#allocation3] sm:$0xff] }
 0x150   : > { %1626 = vst.msk [vmem:[#allocation3 + $0x10] sm:$0xff] %vm482_vm9, %v1616_v57  ;;  %v1442_v61 = vadd.f32 %v1432_v60, %v1407_v59 }
 0x151   : > { %v1607_v63 = vld [vmem:[#allocation3 + $0x18] sm:$0xff]  ;;  %v2829_v0 = vpop.f32.mrf.mxu1  ;;  %v1581_v3 = vpop.f32.mrf.mxu0 }
 0x152   : > { %1452 = vst.msk [vmem:[#allocation3 + $0x28] sm:$0xff] %vm482_vm9, %v1442_v61  ;;  %v1617_v2 = vadd.f32 %v1607_v63, %v1576_v58  ;;  %v3420_v58 = vadd.s32 32, %v3382_v15  ;;  %v2099_v61 = vmul.u32 10, %v2098_v48 }
 0x153   : > { %v1412_v4 = vpop.f32.mrf.mxu1  ;;  %v2850_v8 = vpop.f32.mrf.mxu0  ;;  %v1825_v60 = vld [vmem:[#allocation3 + $0x8] sm:$0xff] }
 0x154   : > { %1627 = vst.msk [vmem:[#allocation3 + $0x18] sm:$0xff] %vm482_vm9, %v1617_v2  ;;  %v1443_v7 = vadd.f32 %v1433_v5, %v1412_v4  ;;  %v2120_v4 = vshrl.u32 %v3405_v43, 3 }
 0x155   : > { %v1608_v9 = vld [vmem:[#allocation3 + $0x20] sm:$0xff]  ;;  %v2832_v10 = vpop.f32.mrf.mxu1  ;;  %v1584_v12 = vpop.f32.mrf.mxu0 }
 0x156   : > { %1453 = vst.msk [vmem:[#allocation3 + $0x30] sm:$0xff] %vm482_vm9, %v1443_v7  ;;  %v1618_v11 = vadd.f32 %v1608_v9, %v1581_v3  ;;  %v2110_v3 = vmul.u32 10, %v2109_v53  ;;  %v3426_v7 = vmul.u32.u64.low 3435973837, %v3420_v58  ;;  %v3427_v8 = vmul.u32.u64.high 3435973837, %v3420_v58, %v3426_v7 }
 0x157   : > { %v1415_v13 = vpop.f32.mrf.mxu1  ;;  %v2851_v17 = vpop.f32.mrf.mxu0  ;;  %v3430_v9 = vadd.s32 40, %v3382_v15 }
 0x158   : > { %1628 = vst.msk [vmem:[#allocation3 + $0x20] sm:$0xff] %vm482_vm9, %v1618_v11  ;;  %v1444_v16 = vadd.f32 %v1434_v14, %v1415_v13  ;;  %v1826_v11 = vld [vmem:[#allocation3 + $0x10] sm:$0xff] }
 0x159   : > { %v1609_v18 = vld [vmem:[#allocation3 + $0x28] sm:$0xff]  ;;  %v2833_v19 = vpop.f32.mrf.mxu1  ;;  %v1589_v22 = vpop.f32.mrf.mxu0 }
 0x15a   : > { %1454 = vst.msk [vmem:[#allocation3 + $0x38] sm:$0xff] %vm482_vm9, %v1444_v16  ;;  %v1619_v21 = vadd.f32 %v1609_v18, %v1584_v12  ;;  %v3433_v12 = vsub.s32 %v3382_v15, %v2099_v61  ;;  %v3437_v18 = vsub.s32 %v3386_v20, %v2110_v3  ;;  %v2131_v19 = vshrl.u32 %v3416_v55, 3 }
 0x15b   : > { %v1420_v23 = vpop.f32.mrf.mxu1  ;;  %v2854_v28 = vpop.f32.mrf.mxu0  ;;  %v3448_v20 = vadd.s32 48, %v3382_v15 }
 0x15c   : > { %1629 = vst.msk [vmem:[#allocation3 + $0x28] sm:$0xff] %vm482_vm9, %v1619_v21  ;;  %v1445_v27 = vadd.f32 %v1435_v24, %v1420_v23  ;;  %v2121_v23 = vmul.u32 10, %v2120_v4  ;;  %v3442_v24 = vmul.u32.u64.low 3435973837, %v3430_v9  ;;  %v3443_v25 = vmul.u32.u64.high 3435973837, %v3430_v9, %v3442_v24 }
 0x15d   : > { %v1610_v29 = vld [vmem:[#allocation3 + $0x30] sm:$0xff]  ;;  %v2836_v30 = vpop.f32.mrf.mxu1  ;;  %v1592_v35 = vpop.f32.mrf.mxu0  ;;  %vm2202_vm10 = vcmp.ne.s32.totalorder %v3433_v12, 0  ;;  %vm2212_vm11 = vcmp.lt.s32.totalorder %v3433_v12, 0  ;;  %vm2203_vm13 = vcmp.ne.s32.totalorder %v3437_v18, 0  ;;  %vm2213_vm14 = vcmp.lt.s32.totalorder %v3437_v18, 0 }
 0x15e   : > { %1455 = vst.msk [vmem:[#allocation3 + $0x40] sm:$0xff] %vm482_vm9, %v1445_v27  ;;  %v1620_v34 = vadd.f32 %v1610_v29, %v1589_v22  ;;  %v1827_v27 = vld [vmem:[#allocation3 + $0x18] sm:$0xff]  ;;  %v2232_v30 = vadd.s32 10, %v3433_v12  ;;  %vm3452_vm12 = vmand %vm2212_vm11, %vm2202_vm10  ;;  %v3464_v42 = vmul.u32.u64.low 3435973837, %v3448_v20  ;;  %v3465_v43 = vmul.u32.u64.high 3435973837, %v3448_v20, %v3464_v42 }
 0x15f   : > { %v1423_v36 = vpop.f32.mrf.mxu1  ;;  %v2855_v39 = vpop.f32.mrf.mxu0  ;;  %v2233_v48 = vadd.s32 10, %v3437_v18  ;;  %vm3485_vm15 = vmand %vm2213_vm14, %vm2203_vm13 }
 0x160   : > { %1630 = vst.msk [vmem:[#allocation3 + $0x30] sm:$0xff] %vm482_vm9, %v1620_v34  ;;  %v1446_v38 = vadd.f32 %v1436_v37, %v1423_v36  ;;  %v2132_v34 = vmul.u32 10, %v2131_v19  ;;  %v2142_v39 = vshrl.u32 %v3427_v8, 3  ;;  %v2164_v19 = vshrl.u32 %v3465_v43, 3 }
 0x161   : > { %v1611_v40 = vld [vmem:[#allocation3 + $0x38] sm:$0xff]  ;;  %v2837_v41 = vpop.f32.mrf.mxu1  ;;  %v1597_v45 = vpop.f32.mrf.mxu0  ;;  %v2243_v4 = vsel %vm3485_vm15, %v2233_v48, %v3437_v18 }
 0x162   : > { %1456 = vst.msk [vmem:[#allocation3 + $0x48] sm:$0xff] %vm482_vm9, %v1446_v38  ;;  %v1621_v1 = vadd.f32 %v1611_v40, %v1592_v35  ;;  %v3459_v38 = vsub.s32 %v3399_v33, %v2121_v23  ;;  %v1828_v41 = vld [vmem:[#allocation3 + $0x20] sm:$0xff]  ;;  %v3474_v33 = vld [vmem:[%s3704_s3] ss:$0 sm:$0xff]  ;;  %v2143_v55 = vmul.u32 10, %v2142_v39  ;;  %v3530_v23 = vadd.s32 72, %v3382_v15 }
 0x163   : > { %v1785_v46 = vpop.f32.mrf.mxu1  ;;  %v2858_v50 = vpop.f32.mrf.mxu0  ;;  %vm3542_vm7 = vcmp.lt.s32.totalorder %v2243_v4, 8 }
 0x164   : > { %1631 = vst.msk [vmem:[#allocation3 + $0x38] sm:$0xff] %vm482_vm9, %v1621_v1  ;;  %v1834_v49 = vadd.f32 %v1824_v47, %v1785_v46  ;;  %v3468_v1 = vadd.s32 56, %v3382_v15  ;;  %v2242_v47 = vsel %vm3452_vm12, %v2232_v30, %v3433_v12  ;;  %vm2204_vm0 = vcmp.ne.s32.totalorder %v3459_v38, 0 }
 0x165   : > { %v1612_v51 = vld [vmem:[#allocation3 + $0x40] sm:$0xff]  ;;  %v2864_v52 = vpop.f32.mrf.mxu1  ;;  %v1600_v57 = vpop.f32.mrf.mxu0  ;;  %vm2214_vm1 = vcmp.lt.s32.totalorder %v3459_v38, 0  ;;  %vm3502_vm2 = vcmp.lt.s32.totalorder %v2242_v47, 8 }
 0x166   : > { %v1622_v56 = vadd.f32 %v1612_v51, %v1597_v45  ;;  %1844 = vst.msk [vmem:[#allocation3] sm:$0xff] %vm482_vm9, %v1834_v49  ;;  %v3481_v51 = vsub.s32 %v3408_v44, %v2132_v34  ;;  %vm3516_vm5 = vmand %vm2214_vm1, %vm2204_vm0 }
 0x167   : > { %v1788_v59 = vpop.f32.mrf.mxu1  ;;  %v2859_v63 = vpop.f32.mrf.mxu0  ;;  %v1830_v18 = vld [vmem:[#allocation3 + $0x30] sm:$0xff] }
 0x168   : > { %1632 = vst.msk [vmem:[#allocation3 + $0x40] sm:$0xff] %vm482_vm9, %v1622_v56  ;;  %v1835_v62 = vadd.f32 %v1825_v60, %v1788_v59  ;;  %v2153_v56 = vshrl.u32 %v3443_v25, 3  ;;  %v1829_v59 = vld [vmem:[#allocation3 + $0x28] sm:$0xff]  ;;  %v3494_v60 = vmul.u32.u64.low 3435973837, %v3468_v1  ;;  %v3495_v61 = vmul.u32.u64.high 3435973837, %v3468_v1, %v3494_v60 }
 0x169   : > { %v1613_v0 = vld [vmem:[#allocation3 + $0x48] sm:$0xff]  ;;  %v2865_v2 = vpop.f32.mrf.mxu1  ;;  %v1963_v6 = vpop.f32.mrf.mxu0  ;;  %vm2205_vm4 = vcmp.ne.s32.totalorder %v3481_v51, 0  ;;  %vm2215_vm6 = vcmp.lt.s32.totalorder %v3481_v51, 0 }
 0x16a   : > { %v1623_v5 = vadd.f32 %v1613_v0, %v1600_v57  ;;  %1845 = vst.msk [vmem:[#allocation3 + $0x8] sm:$0xff] %vm482_vm9, %v1835_v62  ;;  %v3498_v62 = vadd.s32 64, %v3382_v15  ;;  %vm3561_vm10 = vmand %vm2215_vm6, %vm2205_vm4  ;;  %v2175_v42 = vshrl.u32 %v3495_v61, 3 }
 0x16b   : > { %v1793_v10 = vpop.f32.mrf.mxu1  ;;  %v2886_v14 = vpop.f32.mrf.mxu0 }
 0x16c   : > { %1633 = vst.msk [vmem:[#allocation3 + $0x48] sm:$0xff] %vm482_vm9, %v1623_v5  ;;  %v1836_v13 = vadd.f32 %v1826_v11, %v1793_v10  ;;  %v2234_v5 = vadd.s32 10, %v3459_v38  ;;  %v2154_v14 = vmul.u32 10, %v2153_v56  ;;  %v2176_v0 = vmul.u32 10, %v2175_v42 }
 0x16d   : > { %v2002_v16 = vld [vmem:[#allocation3] sm:$0xff]  ;;  %v2868_v17 = vpop.f32.mrf.mxu1  ;;  %v1966_v22 = vpop.f32.mrf.mxu0 }
 0x16e   : > { %1846 = vst.msk [vmem:[#allocation3 + $0x10] sm:$0xff] %vm482_vm9, %v1836_v13  ;;  %v2012_v21 = vadd.f32 %v2002_v16, %v1963_v6  ;;  %v3522_v13 = vsub.s32 %v3420_v58, %v2143_v55 }
 0x16f   : > { %v1796_v26 = vpop.f32.mrf.mxu1  ;;  %v2887_v29 = vpop.f32.mrf.mxu0  ;;  %v1832_v61 = vld [vmem:[#allocation3 + $0x40] sm:$0xff] }
 0x170   : > { %2022 = vst.msk [vmem:[#allocation3] sm:$0xff] %vm482_vm9, %v2012_v21  ;;  %v1837_v28 = vadd.f32 %v1827_v27, %v1796_v26  ;;  %v2235_v29 = vadd.s32 10, %v3481_v51  ;;  %vm2206_vm8 = vcmp.ne.s32.totalorder %v3522_v13, 0  ;;  %vm2216_vm11 = vcmp.lt.s32.totalorder %v3522_v13, 0 }
 0x171   : > { %v2003_v31 = vld [vmem:[#allocation3 + $0x8] sm:$0xff]  ;;  %v2869_v32 = vpop.f32.mrf.mxu1  ;;  %v1971_v37 = vpop.f32.mrf.mxu0  ;;  %v2236_v56 = vadd.s32 10, %v3522_v13  ;;  %vm3590_vm13 = vmand %vm2216_vm11, %vm2206_vm8 }
 0x172   : > { %1847 = vst.msk [vmem:[#allocation3 + $0x18] sm:$0xff] %vm482_vm9, %v1837_v28  ;;  %v2013_v36 = vadd.f32 %v2003_v31, %v1966_v22  ;;  %v3526_v21 = vmul.u32.u64.low 3435973837, %v3498_v62  ;;  %v3527_v22 = vmul.u32.u64.high 3435973837, %v3498_v62, %v3526_v21  ;;  %v2244_v28 = vsel %vm3516_vm5, %v2234_v5, %v3459_v38 }
 0x173   : > { %v1801_v40 = vpop.f32.mrf.mxu1  ;;  %v2890_v46 = vpop.f32.mrf.mxu0  ;;  %vm3575_vm12 = vcmp.lt.s32.totalorder %v2244_v28, 8  ;;  %v2245_v55 = vsel %vm3561_vm10, %v2235_v29, %v3481_v51  ;;  %v1833_v21 = vld [vmem:[#allocation3 + $0x48] sm:$0xff] }
 0x174   : > { %2023 = vst.msk [vmem:[#allocation3 + $0x8] sm:$0xff] %vm482_vm9, %v2013_v36  ;;  %v1838_v45 = vadd.f32 %v1828_v41, %v1801_v40  ;;  %v3553_v36 = vsub.s32 %v3430_v9, %v2154_v14  ;;  %v1831_v40 = vld [vmem:[#allocation3 + $0x38] sm:$0xff]  ;;  %v2165_v41 = vmul.u32 10, %v2164_v19  ;;  %vm3604_vm0 = vcmp.lt.s32.totalorder %v2245_v55, 8 }
 0x175   : > { %v2004_v49 = vld [vmem:[#allocation3 + $0x10] sm:$0xff]  ;;  %v2872_v50 = vpop.f32.mrf.mxu1  ;;  %v1974_v54 = vpop.f32.mrf.mxu0  ;;  %v3567_v43 = vmul.u32.u64.low 3435973837, %v3530_v23  ;;  %v3568_v9 = vmul.u32.u64.high 3435973837, %v3530_v23, %v3567_v43 }
 0x176   : > { %1848 = vst.msk [vmem:[#allocation3 + $0x20] sm:$0xff] %vm482_vm9, %v1838_v45  ;;  %v2014_v53 = vadd.f32 %v2004_v49, %v1971_v37  ;;  %vm2207_vm14 = vcmp.ne.s32.totalorder %v3553_v36, 0  ;;  %vm2217_vm15 = vcmp.lt.s32.totalorder %v3553_v36, 0  ;;  %v2237_v14 = vadd.s32 10, %v3553_v36 }
 0x177   : > { %v2032_v57 = vld [vmem:[#allocation3] sm:$0xff]  ;;  %v1804_v44 = vpop.f32.mrf.mxu1  ;;  %v2891_v3 = vpop.f32.mrf.mxu0  ;;  %vm3619_vm1 = vmand %vm2217_vm15, %vm2207_vm14  ;;  %v2197_v15 = vshrl.u32 %v3568_v9, 3 }
 0x178   : > { %v2049_v63 = vadd.f32 %v3474_v33, %v2032_v57  ;;  %2024 = vst.msk [vmem:[#allocation3 + $0x10] sm:$0xff] %vm482_vm9, %v2014_v53  ;;  %v1839_v2 = vadd.f32 %v1829_v59, %v1804_v44 }
 0x179   : > { %v2005_v6 = vld [vmem:[#allocation3 + $0x18] sm:$0xff]  ;;  %v2873_v7 = vpop.f32.mrf.mxu1  ;;  %v1979_v12 = vpop.f32.mrf.mxu0  ;;  %v2198_v42 = vmul.u32 10, %v2197_v15 }
 0x17a   : > { %v2059_v8 = vmax.f32 %v2049_v63, 0.0  ;;  %1849 = vst.msk [vmem:[#allocation3 + $0x28] sm:$0xff] %vm482_vm9, %v1839_v2  ;;  %v2015_v11 = vadd.f32 %v2005_v6, %v1974_v54  ;;  %v3596_v63 = vsub.s32 %v3448_v20, %v2165_v41  ;;  %v2186_v2 = vshrl.u32 %v3527_v22, 3 }
 0x17b   : > { %v2033_v16 = vld [vmem:[#allocation3 + $0x8] sm:$0xff]  ;;  %v1809_v17 = vpop.f32.mrf.mxu1  ;;  %v2894_v26 = vpop.f32.mrf.mxu0  ;;  %v3626_v22 = vsub.s32 %v3468_v1, %v2176_v0  ;;  %v2247_v1 = vsel %vm3619_vm1, %v2237_v14, %v3553_v36 }
 0x17c   : > { %v2282_v58 = vsel %vm3502_vm2, %v2059_v8, 0.0  ;;  %v2050_v24 = vadd.f32 %v3474_v33, %v2033_v16  ;;  %2025 = vst.msk [vmem:[#allocation3 + $0x18] sm:$0xff] %vm482_vm9, %v2015_v11  ;;  %v1840_v25 = vadd.f32 %v1830_v18, %v1809_v17  ;;  %vm2208_vm2 = vcmp.ne.s32.totalorder %v3596_v63, 0 }
 0x17d   : > { %v2642_v27 = vpack.c.bf16 %v2282_v58, %v2282_v58  ;;  %v2006_v30 = vld [vmem:[#allocation3 + $0x20] sm:$0xff]  ;;  %v2876_v31 = vpop.f32.mrf.mxu1  ;;  %v1982_v35 = vpop.f32.mrf.mxu0  ;;  %vm2218_vm4 = vcmp.lt.s32.totalorder %v3596_v63, 0  ;;  %v2187_v58 = vmul.u32 10, %v2186_v2  ;;  %vm2219_vm8 = vcmp.lt.s32.totalorder %v3626_v22, 0 }
 0x17e   : > { %v2060_v32 = vmax.f32 %v2050_v24, 0.0  ;;  %1850 = vst.msk [vmem:[#allocation3 + $0x30] sm:$0xff] %vm482_vm9, %v1840_v25  ;;  %v2016_v34 = vadd.f32 %v2006_v30, %v1979_v12  ;;  %v2246_v12 = vsel %vm3590_vm13, %v2236_v56, %v3522_v13  ;;  %vm3644_vm6 = vmand %vm2218_vm4, %vm2208_vm2  ;;  %vm2257_vm10 = vcmp.lt.s32.totalorder %v2247_v1, 8 }
 0x17f   : > { %2333 = vst.msk [vmem:[%s3535_s27] sm:$0xf] %vm2332_vm3, %v2642_v27  ;;  %v2034_v37 = vld [vmem:[#allocation3 + $0x10] sm:$0xff]  ;;  %v1812_v39 = vpop.f32.mrf.mxu1  ;;  %v2895_v48 = vpop.f32.mrf.mxu0  ;;  %vm2256_vm5 = vcmp.lt.s32.totalorder %v2246_v12, 8  ;;  %v2188_v36 = vsub.s32 %v3498_v62, %v2187_v58 }
 0x180   : > { %v2283_v45 = vsel %vm3542_vm7, %v2060_v32, 0.0  ;;  %v2051_v46 = vadd.f32 %v3474_v33, %v2034_v37  ;;  %2026 = vst.msk [vmem:[#allocation3 + $0x20] sm:$0xff] %vm482_vm9, %v2016_v34  ;;  %v1841_v47 = vadd.f32 %v1831_v40, %v1812_v39  ;;  %v2238_v32 = vadd.s32 10, %v3596_v63 }
 0x181   : > { %v2643_v49 = vpack.c.bf16 %v2283_v45, %v2283_v45  ;;  %v2007_v52 = vld [vmem:[#allocation3 + $0x28] sm:$0xff]  ;;  %v2877_v53 = vpop.f32.mrf.mxu1  ;;  %v1987_v44 = vpop.f32.mrf.mxu0  ;;  %vm2209_vm7 = vcmp.ne.s32.totalorder %v3626_v22, 0  ;;  %vm2220_vm13 = vcmp.lt.s32.totalorder %v2188_v36, 0  ;;  %v2240_v60 = vadd.s32 10, %v2188_v36 }
 0x182   : > { %v2061_v54 = vmax.f32 %v2051_v46, 0.0  ;;  %1851 = vst.msk [vmem:[#allocation3 + $0x38] sm:$0xff] %vm482_vm9, %v1841_v47  ;;  %v2017_v57 = vadd.f32 %v2007_v52, %v1982_v35  ;;  %v2248_v46 = vsel %vm3644_vm6, %v2238_v32, %v3596_v63  ;;  %v2239_v47 = vadd.s32 10, %v3626_v22  ;;  %vm3661_vm11 = vmand %vm2219_vm8, %vm2209_vm7 }
 0x183   : > { %2334 = vst.msk [vmem:[%s3535_s27 + $0x4] sm:$0xf] %vm2332_vm3, %v2643_v49  ;;  %v2035_v59 = vld [vmem:[#allocation3 + $0x18] sm:$0xff]  ;;  %v1817_v51 = vpop.f32.mrf.mxu1  ;;  %v2898_v6 = vpop.f32.mrf.mxu0  ;;  %vm2258_vm14 = vcmp.lt.s32.totalorder %v2248_v46, 8 }
 0x184   : > { %v2284_v3 = vsel %vm3575_vm12, %v2061_v54, 0.0  ;;  %v2052_v4 = vadd.f32 %v3474_v33, %v2035_v59  ;;  %2027 = vst.msk [vmem:[#allocation3 + $0x28] sm:$0xff] %vm482_vm9, %v2017_v57  ;;  %v1842_v5 = vadd.f32 %v1832_v61, %v1817_v51  ;;  %vm2210_vm12 = vcmp.ne.s32.totalorder %v2188_v36, 0 }
 0x185   : > { %v2644_v7 = vpack.c.bf16 %v2284_v3, %v2284_v3  ;;  %v2008_v20 = vld [vmem:[#allocation3 + $0x30] sm:$0xff]  ;;  %v2880_v10 = vpop.f32.mrf.mxu1  ;;  %v1990_v17 = vpop.f32.mrf.mxu0  ;;  %v2199_v54 = vsub.s32 %v3530_v23, %v2198_v42  ;;  %v2249_v59 = vsel %vm3661_vm11, %v2239_v47, %v3626_v22  ;;  %vm3674_vm15 = vmand %vm2220_vm13, %vm2210_vm12 }
 0x186   : > { %v2062_v11 = vmax.f32 %v2052_v4, 0.0  ;;  %1852 = vst.msk [vmem:[#allocation3 + $0x40] sm:$0xff] %vm482_vm9, %v1842_v5  ;;  %v2018_v16 = vadd.f32 %v2008_v20, %v1987_v44  ;;  %vm2259_vm2 = vcmp.lt.s32.totalorder %v2249_v59, 8  ;;  %v2250_v4 = vsel %vm3674_vm15, %v2240_v60, %v2188_v36 }
 0x187   : > { %2335 = vst.msk [vmem:[%s3535_s27 + $0x8] sm:$0xf] %vm2332_vm3, %v2644_v7  ;;  %v2036_v18 = vld [vmem:[#allocation3 + $0x20] sm:$0xff]  ;;  %v1820_v13 = vpop.f32.mrf.mxu1  ;;  %v2899_v27 = vpop.f32.mrf.mxu0  ;;  %vm2221_vm1 = vcmp.lt.s32.totalorder %v2199_v54, 0  ;;  %v2241_v5 = vadd.s32 10, %v2199_v54 }
 0x188   : > { %v2285_v24 = vsel %vm3604_vm0, %v2062_v11, 0.0  ;;  %v2053_v25 = vadd.f32 %v3474_v33, %v2036_v18  ;;  %2028 = vst.msk [vmem:[#allocation3 + $0x30] sm:$0xff] %vm482_vm9, %v2018_v16  ;;  %v1843_v26 = vadd.f32 %v1833_v21, %v1820_v13  ;;  %vm2211_vm0 = vcmp.ne.s32.totalorder %v2199_v54, 0 }
 0x189   : > { %v2645_v28 = vpack.c.bf16 %v2285_v24, %v2285_v24  ;;  %v2009_v29 = vld [vmem:[#allocation3 + $0x38] sm:$0xff]  ;;  %v2881_v30 = vpop.f32.mrf.mxu1  ;;  %v1995_v35 = vpop.f32.mrf.mxu0  ;;  %vm2231_vm4 = vmand %vm2221_vm1, %vm2211_vm0 }
 0x18a   : > { %v2063_v31 = vmax.f32 %v2053_v25, 0.0  ;;  %1853 = vst.msk [vmem:[#allocation3 + $0x48] sm:$0xff] %vm482_vm9, %v1843_v26  ;;  %v2019_v34 = vadd.f32 %v2009_v29, %v1990_v17  ;;  %v2251_v11 = vsel %vm2231_vm4, %v2241_v5, %v2199_v54 }
 0x18b   : > { %2336 = vst.msk [vmem:[%s3535_s27 + $0xc] sm:$0xf] %vm2332_vm3, %v2645_v28  ;;  %v2037_v37 = vld [vmem:[#allocation3 + $0x28] sm:$0xff]  ;;  %v2902_v41 = vpop.f32.mrf.mxu0 }
 0x18c   : > { %v2286_v39 = vsel %vm2256_vm5, %v2063_v31, 0.0  ;;  %v2054_v40 = vadd.f32 %v3474_v33, %v2037_v37  ;;  %2029 = vst.msk [vmem:[#allocation3 + $0x38] sm:$0xff] %vm482_vm9, %v2019_v34  ;;  %vm2261_vm5 = vcmp.lt.s32.totalorder %v2251_v11, 8 }
 0x18d   : > { %v2646_v43 = vpack.c.bf16 %v2286_v39, %v2286_v39  ;;  %v2010_v9 = vld [vmem:[#allocation3 + $0x40] sm:$0xff]  ;;  %v1998_v48 = vpop.f32.mrf.mxu0 }
 0x18e   : > { %v2064_v45 = vmax.f32 %v2054_v40, 0.0  ;;  %v2020_v62 = vadd.f32 %v2010_v9, %v1995_v35 }
 0x18f   : > { %2337 = vst.msk [vmem:[%s3535_s27 + $0x10] sm:$0xf] %vm2332_vm3, %v2646_v43  ;;  %v2038_v49 = vld [vmem:[#allocation3 + $0x30] sm:$0xff]  ;;  %v2903_v55 = vpop.f32.mrf.mxu0 }
 0x190   : > { %v2287_v52 = vsel %vm2257_vm10, %v2064_v45, 0.0  ;;  %v2055_v53 = vadd.f32 %v3474_v33, %v2038_v49  ;;  %2030 = vst.msk [vmem:[#allocation3 + $0x40] sm:$0xff] %vm482_vm9, %v2020_v62 }
 0x191   : > { %v2647_v56 = vpack.c.bf16 %v2287_v52, %v2287_v52  ;;  %v2011_v57 = vld [vmem:[#allocation3 + $0x48] sm:$0xff] }
 0x192   : > { %v2065_v44 = vmax.f32 %v2055_v53, 0.0  ;;  %v2021_v51 = vadd.f32 %v2011_v57, %v1998_v48 }
 0x193   : > { %2338 = vst.msk [vmem:[%s3535_s27 + $0x14] sm:$0xf] %vm2332_vm3, %v2647_v56  ;;  %v2039_v61 = vld [vmem:[#allocation3 + $0x38] sm:$0xff] }
 0x194   : > { %v2288_v23 = vsel %vm2258_vm14, %v2065_v44, 0.0  ;;  %v2056_v0 = vadd.f32 %v3474_v33, %v2039_v61  ;;  %2031 = vst.msk [vmem:[#allocation3 + $0x48] sm:$0xff] %vm482_vm9, %v2021_v51  ;;  %vm2260_vm9 = vcmp.lt.s32.totalorder %v2250_v4, 8 }
 0x195   : > { %v2648_v2 = vpack.c.bf16 %v2288_v23, %v2288_v23 }
 0x196   : > { %v2066_v3 = vmax.f32 %v2056_v0, 0.0 }
 0x197   : > { %2339 = vst.msk [vmem:[%s3535_s27 + $0x18] sm:$0xf] %vm2332_vm3, %v2648_v2  ;;  %v2040_v6 = vld [vmem:[#allocation3 + $0x40] sm:$0xff] }
 0x198   : > { %v2289_v7 = vsel %vm2259_vm2, %v2066_v3, 0.0  ;;  %v2057_v8 = vadd.f32 %v3474_v33, %v2040_v6 }
 0x199   : > { %v2649_v20 = vpack.c.bf16 %v2289_v7, %v2289_v7 }
 0x19a   : > { %v2067_v10 = vmax.f32 %v2057_v8, 0.0 }
 0x19b   : > { %2340 = vst.msk [vmem:[%s3535_s27 + $0x1c] sm:$0xf] %vm2332_vm3, %v2649_v20  ;;  %v2041_v12 = vld [vmem:[#allocation3 + $0x48] sm:$0xff] }
 0x19c   : > { %v2290_v14 = vsel %vm2260_vm9, %v2067_v10, 0.0  ;;  %v2058_v16 = vadd.f32 %v3474_v33, %v2041_v12 }
 0x19d   : > { %v2650_v17 = vpack.c.bf16 %v2290_v14, %v2290_v14 }
 0x19e   : > { %v2068_v18 = vmax.f32 %v2058_v16, 0.0 }
 0x19f   : > { %2341 = vst.msk [vmem:[%s3535_s27 + $0x20] sm:$0xf] %vm2332_vm3, %v2650_v17 }
 0x1a0   : > { %v2291_v19 = vsel %vm2261_vm5, %v2068_v18, 0.0 }
 0x1a1   : > { %v2651_v13 = vpack.c.bf16 %v2291_v19, %v2291_v19 }
 0x1a3   : > { %2342 = vst.msk [vmem:[%s3535_s27 + $0x24] sm:$0xf] %vm2332_vm3, %v2651_v13 }
 0x1a4 PF: > { %s14_s17 = sadd.s32 1, %s3040_s17   ;;  %s3732_s15 = smov %s3036_s16 }
 0x1a5   : > { %p11_p5 = scmp.ge.s32.totalorder %s14_s17, 4   ;;  %s3733_s16 = smov %s3735_s18 }
 0x1a7   :  { %13 = sbr.rel (!%p11_p5) target bundleno = 2 (0x2), region = 83 }

</bundles_post_ra>
